<compile_context>
chip_gen: v7x
topology: tpu7x:2x2x1
jax: 0.10.0
libtpu: 0.0.40
codegen_flags: <defaults>
</compile_context>

<pallas_src>
import functools

import jax
import jax.numpy as jnp
from jax.experimental import pallas as pl
from jax.experimental.pallas import tpu as pltpu

HIDDEN = 32
HEADS = 4
HC = HEADS * HIDDEN            # 128 : lane-dense per-layer feature width
NUM_LAYERS = 4
IN_CHANNELS = 8
EDGE_CHANNELS = 4
DESCRIPTOR_DIM = 48

_VMEM = pl.BlockSpec(memory_space=pltpu.MemorySpace.VMEM)


# ----------------------------------------------------------------------------
# Single fused kernel: 4x GATConv(+ReLU) + mean-pool + linear head + sigmoid
# ----------------------------------------------------------------------------
def _fused_gat_kernel(x_ref, attn_ref, w_ref, sd_ref, b_ref,
                      pool_ref, wg_ref, dz_ref, o_ref):
    # Additive softmax mask (0 on edges / self loops, -1e30 elsewhere), shared by all layers.
    mask_add = attn_ref[NUM_LAYERS * HEADS, :, :]                       # [N, N]

    # colmask[h, 0, k] = 1.0 iff lane k lies in head h's 32-wide column block (iota, hoisted).
    lane = jax.lax.broadcasted_iota(jnp.int32, (HEADS, 1, HC), 2)
    head = jax.lax.broadcasted_iota(jnp.int32, (HEADS, 1, HC), 0)
    lo = head * HIDDEN
    colmask = jnp.where((lane >= lo) & (lane < lo + HIDDEN), 1.0, 0.0)  # [H, 1, HC] f32

    # Head-mean matrix m_mean[r, c] = 1/H iff (r mod HIDDEN) == c (HIDDEN is a power of 2).
    rr = jax.lax.broadcasted_iota(jnp.int32, (HC, HIDDEN), 0)
    cc = jax.lax.broadcasted_iota(jnp.int32, (HC, HIDDEN), 1)
    m_mean = jnp.where(jnp.bitwise_and(rr, HIDDEN - 1) == cc, 1.0 / HEADS, 0.0)

    h = x_ref[...]                                                      # [N, 128]
    for l in range(NUM_LAYERS):
        concat = l < NUM_LAYERS - 1
        ae = attn_ref[l * HEADS:(l + 1) * HEADS, :, :]                  # [H, N, N]

        # projection (one lane-dense MXU matmul) + fused src|dst attention scalars
        xp = jnp.dot(h, w_ref[l, :, :],
                     preferred_element_type=jnp.float32)                # [N, HC]
        asd = jnp.dot(xp, sd_ref[l, :, :],
                      preferred_element_type=jnp.float32)               # [N, 2H]
        asd_t = asd.T                                                   # [2H, N] tiny transpose
        a_src_t = asd_t[:HEADS]                                         # [H, N]
        a_dst_t = asd_t[HEADS:]                                         # [H, N]

        # attention logits for all heads at once
        logit = a_dst_t[:, :, None] + a_src_t[:, None, :] + ae          # [H, N, N]
        logit = jnp.maximum(logit, 0.2 * logit)                         # LeakyReLU(0.2)
        logit = logit + mask_add                                        # mask non-edges
        mrow = jnp.max(logit, axis=-1, keepdims=True)
        p = jnp.exp(logit - mrow)                                       # masked lanes -> 0
        inv = pl.reciprocal(jnp.sum(p, axis=-1, keepdims=True))         # [H, N, 1] exact

        # head-batched aggregation -- no sub-128-lane slices, no concatenates
        xp_m = xp[None, :, :] * colmask                                 # [H, N, HC]
        y = jnp.einsum('hij,hjk->hik', p, xp_m,
                       preferred_element_type=jnp.float32)              # [H, N, HC]
        out = jnp.sum(y * inv, axis=0) + b_ref[l, :, :]                 # [N, HC]
        if not concat:
            # mean over heads (bias was pre-tiled so (out + bias_tiled) @ M == mean + bias)
            out = jnp.dot(out, m_mean, preferred_element_type=jnp.float32)   # [N, C]
        h = jnp.maximum(out, 0.0)                                       # ReLU

    # global mean pool + final linear head (descriptor branch pre-folded into dz) + sigmoid
    g = jnp.dot(pool_ref[...], h, preferred_element_type=jnp.float32)   # [B, C]
    z = jnp.dot(g, wg_ref[...], preferred_element_type=jnp.float32) + dz_ref[...]
    o_ref[...] = 1.0 / (1.0 + jnp.exp(-z))


def fused_gat_forward(x_pad, attn_pack, w_stack, sd_stack, bias_stack, pool, wg, dz):
    b = pool.shape[0]
    args = (x_pad, attn_pack, w_stack, sd_stack, bias_stack, pool, wg, dz)
    return pl.pallas_call(
        _fused_gat_kernel,
        out_shape=jax.ShapeDtypeStruct((b, 1), jnp.float32),
        in_specs=[_VMEM] * len(args),
        out_specs=_VMEM,
        compiler_params=pltpu.CompilerParams(vmem_limit_bytes=32 * 1024 * 1024),
    )(*args)


# ----------------------------------------------------------------------------
# Parameters (deterministic synthetic init; shapes match the PyTorch module)
# ----------------------------------------------------------------------------
def init_params(key):
    keys = iter(jax.random.split(key, 64))

    def nrm(shape, scale=0.1):
        return scale * jax.random.normal(next(keys), shape, dtype=jnp.float32)

    p = {}
    # edge_encoder: Linear(4, 32)   (stored pre-transposed [in, out])
    p["edge_w"] = nrm((EDGE_CHANNELS, HIDDEN))
    p["edge_b"] = nrm((1, HIDDEN))

    w_stack, sd_stack, bias_stack, vedge_all, raw_layers = [], [], [], [], []
    eye_h = jnp.eye(HEADS, dtype=jnp.float32)
    din = IN_CHANNELS
    for i in range(NUM_LAYERS):
        concat = i < NUM_LAYERS - 1
        W = nrm((HC, din))               # GATConv.lin weight   [H*C, Din] (bias=False)
        We = nrm((HC, HIDDEN))           # GATConv.lin_edge     [H*C, De]  (bias=False)
        att_src = nrm((HEADS, HIDDEN))
        att_dst = nrm((HEADS, HIDDEN))
        att_edge = nrm((HEADS, HIDDEN))
        bias = nrm((HC if concat else HIDDEN,))
        raw_layers.append(dict(W=W, We=We, att_src=att_src, att_dst=att_dst,
                               att_edge=att_edge, bias=bias))

        # projection weight, zero-padded on the contraction rows to 128 (x is zero-padded too)
        w_pad = jnp.zeros((HC, HC), jnp.float32).at[:din, :].set(W.T)
        w_stack.append(w_pad)

        # fold att_src / att_dst against xp's per-head column blocks:
        #   a_src = xp @ sd[:, :H],  a_dst = xp @ sd[:, H:]   (exact algebraic identity)
        sd_src = (att_src[:, :, None] * eye_h[:, None, :]).reshape(HC, HEADS)
        sd_dst = (att_dst[:, :, None] * eye_h[:, None, :]).reshape(HC, HEADS)
        sd_stack.append(jnp.concatenate([sd_src, sd_dst], axis=1))      # [128, 2H]

        if concat:
            bias_stack.append(bias.reshape(1, HC))
        else:
            # tiled 4x so (agg + bias_tiled) @ m_mean == mean(agg) + bias
            bias_stack.append(jnp.tile(bias.reshape(1, HIDDEN), (1, HEADS)))

        # fold att_edge into lin_edge: ae[e, h] = edge_emb[e] @ vedge[h]
        We_r = We.reshape(HEADS, HIDDEN, HIDDEN)
        vedge_all.append(jnp.einsum("hc,hcd->hd", att_edge, We_r))       # [H, De]

        din = HC if concat else HIDDEN

    p["w_stack"] = jnp.stack(w_stack)            # [L, 128, 128]
    p["sd_stack"] = jnp.stack(sd_stack)          # [L, 128, 8]
    p["bias_stack"] = jnp.stack(bias_stack)      # [L, 1, 128]
    p["vedge_all"] = jnp.concatenate(vedge_all, axis=0)   # [L*H, 32]
    p["raw_layers"] = raw_layers                 # used only by the pure-JAX reference

    # descriptor_net: Linear(48, 32) + ReLU (+ Dropout, identity in eval)
    p["desc_w"] = nrm((DESCRIPTOR_DIM, HIDDEN))
    p["desc_b"] = nrm((1, HIDDEN))
    # lin: Linear(64, 1), split into the graph-embedding half and descriptor half
    lin_w = nrm((1, 2 * HIDDEN))
    p["lin_wg"] = lin_w[:, :HIDDEN].T            # [32, 1]
    p["lin_wd"] = lin_w[:, HIDDEN:].T            # [32, 1]
    p["lin_b"] = nrm((1, 1))
    return p


# ----------------------------------------------------------------------------
# Forward pass (jitted; scatter glue in JAX, everything dense in one Pallas call)
# ----------------------------------------------------------------------------
@functools.partial(jax.jit, static_argnames=("num_graphs",))
def gat_optuna_forward(params, x, edge_index, edge_attr, batch, descriptors,
                       num_graphs):
    n = x.shape[0]
    src = edge_index[0]
    dst = edge_index[1]

    # edge encoder: tiny [E,4]x[4,32] -- plain JAX so XLA fuses it with the scatter glue
    edge_emb = edge_attr @ params["edge_w"] + params["edge_b"]           # [E, 32]

    # Dense adjacency [target i, source j] with GATConv's added self loops, as additive mask.
    adj = jnp.zeros((n, n), jnp.float32).at[dst, src].set(1.0)
    adj = jnp.maximum(adj, jnp.eye(n, dtype=jnp.float32))
    mask_add = (adj - 1.0) * 1e30                                        # 0 on edges, -1e30 off

    # Self-loop edge features use fill_value='mean' (mean of incoming edge features per target).
    deg = jnp.zeros((n,), jnp.float32).at[dst].add(1.0)
    sums = jnp.zeros((n, HIDDEN), jnp.float32).at[dst].add(edge_emb)
    loop_attr = jnp.where(deg[:, None] > 0,
                          sums / jnp.maximum(deg, 1.0)[:, None], 0.0)    # [N, 32]

    # Per-edge attention scalars for every layer & head, scattered dense ONCE,
    # packed together with the additive mask into a single kernel input.
    vedge_all = params["vedge_all"]                                      # [L*H, 32]
    ae_edge = edge_emb @ vedge_all.T                                     # [E, L*H]
    ae_loop = loop_attr @ vedge_all.T                                    # [N, L*H]
    idx = jnp.arange(n)
    ae = jnp.zeros((n, n, NUM_LAYERS * HEADS), jnp.float32)
    ae = ae.at[dst, src, :].set(ae_edge)
    ae = ae.at[idx, idx, :].set(ae_loop)
    ae = jnp.transpose(ae, (2, 0, 1))                                    # [L*H, N, N]
    attn_pack = jnp.concatenate([ae, mask_add[None]], axis=0)            # [L*H+1, N, N]

    # global_mean_pool as a [B, N] averaging matrix, fused into the head inside the kernel
    onehot = (batch[None, :] == jnp.arange(num_graphs)[:, None]).astype(jnp.float32)
    counts = jnp.sum(onehot, axis=1, keepdims=True)
    pool = onehot / jnp.maximum(counts, 1.0)                             # [B, N]

    # descriptor MLP folded into a per-graph logit offset dz (tiny; fuses with the glue)
    d = jnp.maximum(descriptors @ params["desc_w"] + params["desc_b"], 0.0)
    dz = d @ params["lin_wd"] + params["lin_b"]                          # [B, 1]

    # pad node features to the lane-dense 128-column width used by every layer
    x_pad = jnp.pad(x, ((0, 0), (0, HC - x.shape[1])))                   # [N, 128]

    out = fused_gat_forward(x_pad, attn_pack, params["w_stack"],
                            params["sd_stack"], params["bias_stack"],
                            pool, params["lin_wg"], dz)
    # F.dropout(training=False) -> identity (eval mode)
    return out.reshape(-1)                                               # .view(-1)


# ----------------------------------------------------------------------------
# Pure-JAX reference (uses the raw, un-folded parameters) for a correctness check
# ----------------------------------------------------------------------------
def _reference_forward(params, x, edge_index, edge_attr, batch, descriptors,
                       num_graphs):
    n = x.shape[0]
    src, dst = edge_index[0], edge_index[1]
    edge_emb = edge_attr @ params["edge_w"] + params["edge_b"]
    adj = jnp.zeros((n, n), jnp.float32).at[dst, src].set(1.0)
    adj = jnp.maximum(adj, jnp.eye(n, dtype=jnp.float32))
    deg = jnp.zeros((n,), jnp.float32).at[dst].add(1.0)
    sums = jnp.zeros((n, HIDDEN), jnp.float32).at[dst].add(edge_emb)
    loop_attr = jnp.where(deg[:, None] > 0,
                          sums / jnp.maximum(deg, 1.0)[:, None], 0.0)
    e_feat = jnp.zeros((n, n, HIDDEN), jnp.float32).at[dst, src, :].set(edge_emb)
    idx = jnp.arange(n)
    e_feat = e_feat.at[idx, idx, :].set(loop_attr)

    h = x
    for l, lp in enumerate(params["raw_layers"]):
        concat = l < NUM_LAYERS - 1
        xp = h @ lp["W"].T                                               # [N, H*C]
        xph = xp.reshape(n, HEADS, HIDDEN)                               # [N, H, C]
        a_src = jnp.einsum("nhc,hc->nh", xph, lp["att_src"])
        a_dst = jnp.einsum("nhc,hc->nh", xph, lp["att_dst"])
        ef = (e_feat.reshape(n * n, HIDDEN) @ lp["We"].T).reshape(n, n, HEADS, HIDDEN)
        a_edge = jnp.einsum("ijhc,hc->hij", ef, lp["att_edge"])          # [H, N, N]
        logit = a_dst.T[:, :, None] + a_src.T[:, None, :] + a_edge
        logit = jnp.where(logit > 0, logit, 0.2 * logit)
        logit = jnp.where(adj[None, :, :] > 0, logit, -jnp.inf)
        p_att = jax.nn.softmax(logit, axis=-1)                           # [H, N, N]
        o = jnp.einsum("hij,jhc->hic", p_att, xph)                       # [H, N, C]
        if concat:
            o = o.transpose(1, 0, 2).reshape(n, HC) + lp["bias"]
        else:
            o = o.mean(axis=0) + lp["bias"]
        h = jax.nn.relu(o)

    onehot = (batch[None, :] == jnp.arange(num_graphs)[:, None]).astype(jnp.float32)
    pool = onehot / jnp.maximum(onehot.sum(axis=1, keepdims=True), 1.0)
    g = pool @ h
    d = jax.nn.relu(descriptors @ params["desc_w"] + params["desc_b"])
    z = g @ params["lin_wg"] + d @ params["lin_wd"] + params["lin_b"]
    return jax.nn.sigmoid(z).reshape(-1)


# ----------------------------------------------------------------------------
if __name__ == "__main__":
    key = jax.random.PRNGKey(0)
    k_x, k_e, k_d = jax.random.split(key, 3)

    N_PER_GRAPH, B = 8, 2
    N = N_PER_GRAPH * B
    x = jax.random.normal(k_x, (N, IN_CHANNELS), dtype=jnp.float32)

    # bidirectional ring inside each graph: no self loops, no duplicate edges
    srcs, dsts = [], []
    for g in range(B):
        for i in range(N_PER_GRAPH):
            a = g * N_PER_GRAPH + i
            b = g * N_PER_GRAPH + (i + 1) % N_PER_GRAPH
            srcs += [a, b]
            dsts += [b, a]
    edge_index = jnp.array([srcs, dsts], dtype=jnp.int32)               # [2, 32]
    E = edge_index.shape[1]
    edge_attr = jax.random.normal(k_e, (E, EDGE_CHANNELS), dtype=jnp.float32)
    batch = jnp.repeat(jnp.arange(B, dtype=jnp.int32), N_PER_GRAPH)     # [16]
    descriptors = jax.random.normal(k_d, (B, DESCRIPTOR_DIM), dtype=jnp.float32)

    params = init_params(jax.random.PRNGKey(42))

    out = gat_optuna_forward(params, x, edge_index, edge_attr, batch,
                             descriptors, num_graphs=B)
    jax.block_until_ready(out)
    assert out.shape == (B,)
    assert bool(jnp.all(jnp.isfinite(out)))

    ref = _reference_forward(params, x, edge_index, edge_attr, batch,
                             descriptors, num_graphs=B)
    max_diff = float(jnp.max(jnp.abs(out - ref)))
    assert max_diff < 1e-2, f"kernel vs reference mismatch: {max_diff}"
    print("KERNEL_OK")
</pallas_src>

<mosaic_0001>
module attributes {stable_mosaic.version = 11 : i64} {
  func.func private @main(%arg0: i32) attributes {dimension_semantics = [#tpu.dimension_semantics<core_parallel>], iteration_bounds = array<i64: 2>, tpu.core_type = #tpu.core_type<sc_scalar_subcore>, window_params = []} {
    return
  }
}

module attributes {stable_mosaic.version = 11 : i64} {
  func.func private @main(%arg0: i32) attributes {dimension_semantics = [#tpu.dimension_semantics<core_parallel>], iteration_bounds = array<i64: 2>, tpu.core_type = #tpu.core_type<sc_scalar_subcore>, window_params = []} {
    return
  }
}

module attributes {stable_mosaic.version = 11 : i64} {
  func.func @_fused_gat_kernel(%arg0: memref<16x128xf32, #tpu.memory_space<vmem>>, %arg1: memref<17x16x16xf32, #tpu.memory_space<vmem>>, %arg2: memref<4x128x128xf32, #tpu.memory_space<vmem>>, %arg3: memref<4x128x8xf32, #tpu.memory_space<vmem>>, %arg4: memref<4x1x128xf32, #tpu.memory_space<vmem>>, %arg5: memref<2x16xf32, #tpu.memory_space<vmem>>, %arg6: memref<32x1xf32, #tpu.memory_space<vmem>>, %arg7: memref<2x1xf32, #tpu.memory_space<vmem>>, %arg8: memref<2x1xf32, #tpu.memory_space<vmem>>) attributes {dimension_semantics = [], scalar_prefetch = 0 : i64, scratch_operands = 0 : i64, tpu.core_type = #tpu.core_type<tc>} {
    %c16 = arith.constant 16 : index
    %c0 = arith.constant 0 : index
    %c0_0 = arith.constant 0 : index
    %0 = vector.load %arg1[%c16, %c0, %c0_0] : memref<17x16x16xf32, #tpu.memory_space<vmem>>, vector<1x16x16xf32>
    %1 = vector.shape_cast %0 : vector<1x16x16xf32> to vector<16x16xf32>
    %2 = tpu.iota {dimensions = array<i32: 2>} : vector<4x1x128xi32>
    %3 = tpu.iota {dimensions = array<i32: 0>} : vector<4x1x128xi32>
    %c32_i32 = arith.constant 32 : i32
    %4 = vector.broadcast %c32_i32 : i32 to vector<4x1x128xi32>
    %5 = arith.muli %3, %4 : vector<4x1x128xi32>
    %6 = arith.cmpi sge, %2, %5 : vector<4x1x128xi32>
    %c32_i32_1 = arith.constant 32 : i32
    %7 = vector.broadcast %c32_i32_1 : i32 to vector<4x1x128xi32>
    %8 = arith.addi %5, %7 : vector<4x1x128xi32>
    %9 = arith.cmpi slt, %2, %8 : vector<4x1x128xi32>
    %10 = arith.andi %6, %9 : vector<4x1x128xi1>
    %cst = arith.constant 1.000000e+00 : f32
    %cst_2 = arith.constant 0.000000e+00 : f32
    %11 = vector.broadcast %cst : f32 to vector<4x1x128xf32>
    %12 = vector.broadcast %cst_2 : f32 to vector<4x1x128xf32>
    %13 = arith.select %10, %11, %12 : vector<4x1x128xi1>, vector<4x1x128xf32>
    %14 = tpu.iota {dimensions = array<i32: 0>} : vector<128x32xi32>
    %15 = tpu.iota {dimensions = array<i32: 1>} : vector<128x32xi32>
    %c31_i32 = arith.constant 31 : i32
    %16 = vector.broadcast %c31_i32 : i32 to vector<128x32xi32>
    %17 = arith.andi %14, %16 : vector<128x32xi32>
    %18 = arith.cmpi eq, %17, %15 : vector<128x32xi32>
    %cst_3 = arith.constant 2.500000e-01 : f32
    %cst_4 = arith.constant 0.000000e+00 : f32
    %19 = vector.broadcast %cst_3 : f32 to vector<128x32xf32>
    %20 = vector.broadcast %cst_4 : f32 to vector<128x32xf32>
    %21 = arith.select %18, %19, %20 : vector<128x32xi1>, vector<128x32xf32>
    %c0_5 = arith.constant 0 : index
    %c0_6 = arith.constant 0 : index
    %22 = vector.load %arg0[%c0_5, %c0_6] : memref<16x128xf32, #tpu.memory_space<vmem>>, vector<16x128xf32>
    %c0_7 = arith.constant 0 : index
    %c0_8 = arith.constant 0 : index
    %c0_9 = arith.constant 0 : index
    %23 = vector.load %arg1[%c0_7, %c0_8, %c0_9] : memref<17x16x16xf32, #tpu.memory_space<vmem>>, vector<4x16x16xf32>
    %c0_10 = arith.constant 0 : index
    %c0_11 = arith.constant 0 : index
    %c0_12 = arith.constant 0 : index
    %24 = vector.load %arg2[%c0_10, %c0_11, %c0_12] : memref<4x128x128xf32, #tpu.memory_space<vmem>>, vector<1x128x128xf32>
    %25 = vector.shape_cast %24 : vector<1x128x128xf32> to vector<128x128xf32>
    %cst_13 = arith.constant dense<0.000000e+00> : vector<16x128xf32>
    %26 = tpu.matmul %22, %25, %cst_13 {dimension_numbers = #tpu.dot_dimension_numbers<[1], [0], [0], [1], [0, 0, 1, 1], [], []>} : vector<16x128xf32>, vector<128x128xf32>, vector<16x128xf32> -> vector<16x128xf32>
    %c0_14 = arith.constant 0 : index
    %c0_15 = arith.constant 0 : index
    %c0_16 = arith.constant 0 : index
    %27 = vector.load %arg3[%c0_14, %c0_15, %c0_16] : memref<4x128x8xf32, #tpu.memory_space<vmem>>, vector<1x128x8xf32>
    %28 = vector.shape_cast %27 : vector<1x128x8xf32> to vector<128x8xf32>
    %cst_17 = arith.constant dense<0.000000e+00> : vector<16x8xf32>
    %29 = tpu.matmul %26, %28, %cst_17 {dimension_numbers = #tpu.dot_dimension_numbers<[1], [0], [0], [1], [0, 0, 1, 1], [], []>} : vector<16x128xf32>, vector<128x8xf32>, vector<16x8xf32> -> vector<16x8xf32>
    %30 = tpu.transpose %29, [1, 0] : vector<16x8xf32> -> vector<8x16xf32>
    %31 = vector.extract_strided_slice %30 {offsets = [0, 0], sizes = [4, 16], strides = [1, 1]} : vector<8x16xf32> to vector<4x16xf32>
    %32 = vector.extract_strided_slice %30 {offsets = [4, 0], sizes = [4, 16], strides = [1, 1]} : vector<8x16xf32> to vector<4x16xf32>
    %33 = vector.shape_cast %32 : vector<4x16xf32> to vector<4x16x1xf32>
    %34 = vector.shape_cast %31 : vector<4x16xf32> to vector<4x1x16xf32>
    %35 = vector.broadcast %33 : vector<4x16x1xf32> to vector<4x16x16xf32>
    %36 = vector.broadcast %34 : vector<4x1x16xf32> to vector<4x16x16xf32>
    %37 = arith.addf %35, %36 : vector<4x16x16xf32>
    %38 = arith.addf %37, %23 : vector<4x16x16xf32>
    %cst_18 = arith.constant 2.000000e-01 : f32
    %39 = vector.broadcast %cst_18 : f32 to vector<4x16x16xf32>
    %40 = arith.mulf %39, %38 : vector<4x16x16xf32>
    %41 = arith.maximumf %38, %40 : vector<4x16x16xf32>
    %42 = vector.shape_cast %1 : vector<16x16xf32> to vector<1x16x16xf32>
    %43 = vector.broadcast %42 : vector<1x16x16xf32> to vector<4x16x16xf32>
    %44 = arith.addf %41, %43 : vector<4x16x16xf32>
    %cst_19 = arith.constant dense<0xFF800000> : vector<4x16xf32>
    %45 = vector.multi_reduction <maximumf>, %44, %cst_19 [2] : vector<4x16x16xf32> to vector<4x16xf32>
    %46 = vector.shape_cast %45 : vector<4x16xf32> to vector<4x16x1xf32>
    %47 = vector.broadcast %46 : vector<4x16x1xf32> to vector<4x16x16xf32>
    %48 = arith.subf %44, %47 : vector<4x16x16xf32>
    %49 = math.exp %48 : vector<4x16x16xf32>
    %cst_20 = arith.constant dense<0.000000e+00> : vector<4x16xf32>
    %50 = vector.multi_reduction <add>, %49, %cst_20 [2] : vector<4x16x16xf32> to vector<4x16xf32>
    %51 = vector.shape_cast %50 : vector<4x16xf32> to vector<4x16x1xf32>
    %52 = tpu.reciprocal %51 : vector<4x16x1xf32> -> vector<4x16x1xf32>
    %53 = vector.shape_cast %26 : vector<16x128xf32> to vector<1x16x128xf32>
    %54 = vector.broadcast %53 : vector<1x16x128xf32> to vector<4x16x128xf32>
    %55 = vector.broadcast %13 : vector<4x1x128xf32> to vector<4x16x128xf32>
    %56 = arith.mulf %54, %55 : vector<4x16x128xf32>
    "tpu.trace_start"() <{level = 10 : i32, message = "hij,hjk->hik"}> : () -> ()
    %cst_21 = arith.constant dense<0.000000e+00> : vector<4x16x128xf32>
    %57 = tpu.matmul %49, %56, %cst_21 {dimension_numbers = #tpu.dot_dimension_numbers<[2], [1], [1], [2], [0, 0, 0, 1, 1, 2], [0], [0]>} : vector<4x16x16xf32>, vector<4x16x128xf32>, vector<4x16x128xf32> -> vector<4x16x128xf32>
    "tpu.trace_stop"() : () -> ()
    %58 = vector.broadcast %52 : vector<4x16x1xf32> to vector<4x16x128xf32>
    %59 = arith.mulf %57, %58 : vector<4x16x128xf32>
    %cst_22 = arith.constant dense<0.000000e+00> : vector<16x128xf32>
    %60 = vector.multi_reduction <add>, %59, %cst_22 [0] : vector<4x16x128xf32> to vector<16x128xf32>
    %c0_23 = arith.constant 0 : index
    %c0_24 = arith.constant 0 : index
    %c0_25 = arith.constant 0 : index
    %61 = vector.load %arg4[%c0_23, %c0_24, %c0_25] : memref<4x1x128xf32, #tpu.memory_space<vmem>>, vector<1x1x128xf32>
    %62 = vector.shape_cast %61 : vector<1x1x128xf32> to vector<1x128xf32>
    %63 = vector.broadcast %62 : vector<1x128xf32> to vector<16x128xf32>
    %64 = arith.addf %60, %63 : vector<16x128xf32>
    %cst_26 = arith.constant 0.000000e+00 : f32
    %65 = vector.broadcast %cst_26 : f32 to vector<16x128xf32>
    %66 = arith.maximumf %64, %65 : vector<16x128xf32>
    %c4 = arith.constant 4 : index
    %c0_27 = arith.constant 0 : index
    %c0_28 = arith.constant 0 : index
    %67 = vector.load %arg1[%c4, %c0_27, %c0_28] : memref<17x16x16xf32, #tpu.memory_space<vmem>>, vector<4x16x16xf32>
    %c1 = arith.constant 1 : index
    %c0_29 = arith.constant 0 : index
    %c0_30 = arith.constant 0 : index
    %68 = vector.load %arg2[%c1, %c0_29, %c0_30] : memref<4x128x128xf32, #tpu.memory_space<vmem>>, vector<1x128x128xf32>
    %69 = vector.shape_cast %68 : vector<1x128x128xf32> to vector<128x128xf32>
    %cst_31 = arith.constant dense<0.000000e+00> : vector<16x128xf32>
    %70 = tpu.matmul %66, %69, %cst_31 {dimension_numbers = #tpu.dot_dimension_numbers<[1], [0], [0], [1], [0, 0, 1, 1], [], []>} : vector<16x128xf32>, vector<128x128xf32>, vector<16x128xf32> -> vector<16x128xf32>
    %c1_32 = arith.constant 1 : index
    %c0_33 = arith.constant 0 : index
    %c0_34 = arith.constant 0 : index
    %71 = vector.load %arg3[%c1_32, %c0_33, %c0_34] : memref<4x128x8xf32, #tpu.memory_space<vmem>>, vector<1x128x8xf32>
    %72 = vector.shape_cast %71 : vector<1x128x8xf32> to vector<128x8xf32>
    %cst_35 = arith.constant dense<0.000000e+00> : vector<16x8xf32>
    %73 = tpu.matmul %70, %72, %cst_35 {dimension_numbers = #tpu.dot_dimension_numbers<[1], [0], [0], [1], [0, 0, 1, 1], [], []>} : vector<16x128xf32>, vector<128x8xf32>, vector<16x8xf32> -> vector<16x8xf32>
    %74 = tpu.transpose %73, [1, 0] : vector<16x8xf32> -> vector<8x16xf32>
    %75 = vector.extract_strided_slice %74 {offsets = [0, 0], sizes = [4, 16], strides = [1, 1]} : vector<8x16xf32> to vector<4x16xf32>
    %76 = vector.extract_strided_slice %74 {offsets = [4, 0], sizes = [4, 16], strides = [1, 1]} : vector<8x16xf32> to vector<4x16xf32>
    %77 = vector.shape_cast %76 : vector<4x16xf32> to vector<4x16x1xf32>
    %78 = vector.shape_cast %75 : vector<4x16xf32> to vector<4x1x16xf32>
    %79 = vector.broadcast %77 : vector<4x16x1xf32> to vector<4x16x16xf32>
    %80 = vector.broadcast %78 : vector<4x1x16xf32> to vector<4x16x16xf32>
    %81 = arith.addf %79, %80 : vector<4x16x16xf32>
    %82 = arith.addf %81, %67 : vector<4x16x16xf32>
    %cst_36 = arith.constant 2.000000e-01 : f32
    %83 = vector.broadcast %cst_36 : f32 to vector<4x16x16xf32>
    %84 = arith.mulf %83, %82 : vector<4x16x16xf32>
    %85 = arith.maximumf %82, %84 : vector<4x16x16xf32>
    %86 = vector.shape_cast %1 : vector<16x16xf32> to vector<1x16x16xf32>
    %87 = vector.broadcast %86 : vector<1x16x16xf32> to vector<4x16x16xf32>
    %88 = arith.addf %85, %87 : vector<4x16x16xf32>
    %cst_37 = arith.constant dense<0xFF800000> : vector<4x16xf32>
    %89 = vector.multi_reduction <maximumf>, %88, %cst_37 [2] : vector<4x16x16xf32> to vector<4x16xf32>
    %90 = vector.shape_cast %89 : vector<4x16xf32> to vector<4x16x1xf32>
    %91 = vector.broadcast %90 : vector<4x16x1xf32> to vector<4x16x16xf32>
    %92 = arith.subf %88, %91 : vector<4x16x16xf32>
    %93 = math.exp %92 : vector<4x16x16xf32>
    %cst_38 = arith.constant dense<0.000000e+00> : vector<4x16xf32>
    %94 = vector.multi_reduction <add>, %93, %cst_38 [2] : vector<4x16x16xf32> to vector<4x16xf32>
    %95 = vector.shape_cast %94 : vector<4x16xf32> to vector<4x16x1xf32>
    %96 = tpu.reciprocal %95 : vector<4x16x1xf32> -> vector<4x16x1xf32>
    %97 = vector.shape_cast %70 : vector<16x128xf32> to vector<1x16x128xf32>
    %98 = vector.broadcast %97 : vector<1x16x128xf32> to vector<4x16x128xf32>
    %99 = vector.broadcast %13 : vector<4x1x128xf32> to vector<4x16x128xf32>
    %100 = arith.mulf %98, %99 : vector<4x16x128xf32>
    "tpu.trace_start"() <{level = 10 : i32, message = "hij,hjk->hik"}> : () -> ()
    %cst_39 = arith.constant dense<0.000000e+00> : vector<4x16x128xf32>
    %101 = tpu.matmul %93, %100, %cst_39 {dimension_numbers = #tpu.dot_dimension_numbers<[2], [1], [1], [2], [0, 0, 0, 1, 1, 2], [0], [0]>} : vector<4x16x16xf32>, vector<4x16x128xf32>, vector<4x16x128xf32> -> vector<4x16x128xf32>
    "tpu.trace_stop"() : () -> ()
    %102 = vector.broadcast %96 : vector<4x16x1xf32> to vector<4x16x128xf32>
    %103 = arith.mulf %101, %102 : vector<4x16x128xf32>
    %cst_40 = arith.constant dense<0.000000e+00> : vector<16x128xf32>
    %104 = vector.multi_reduction <add>, %103, %cst_40 [0] : vector<4x16x128xf32> to vector<16x128xf32>
    %c1_41 = arith.constant 1 : index
    %c0_42 = arith.constant 0 : index
    %c0_43 = arith.constant 0 : index
    %105 = vector.load %arg4[%c1_41, %c0_42, %c0_43] : memref<4x1x128xf32, #tpu.memory_space<vmem>>, vector<1x1x128xf32>
    %106 = vector.shape_cast %105 : vector<1x1x128xf32> to vector<1x128xf32>
    %107 = vector.broadcast %106 : vector<1x128xf32> to vector<16x128xf32>
    %108 = arith.addf %104, %107 : vector<16x128xf32>
    %cst_44 = arith.constant 0.000000e+00 : f32
    %109 = vector.broadcast %cst_44 : f32 to vector<16x128xf32>
    %110 = arith.maximumf %108, %109 : vector<16x128xf32>
    %c8 = arith.constant 8 : index
    %c0_45 = arith.constant 0 : index
    %c0_46 = arith.constant 0 : index
    %111 = vector.load %arg1[%c8, %c0_45, %c0_46] : memref<17x16x16xf32, #tpu.memory_space<vmem>>, vector<4x16x16xf32>
    %c2 = arith.constant 2 : index
    %c0_47 = arith.constant 0 : index
    %c0_48 = arith.constant 0 : index
    %112 = vector.load %arg2[%c2, %c0_47, %c0_48] : memref<4x128x128xf32, #tpu.memory_space<vmem>>, vector<1x128x128xf32>
    %113 = vector.shape_cast %112 : vector<1x128x128xf32> to vector<128x128xf32>
    %cst_49 = arith.constant dense<0.000000e+00> : vector<16x128xf32>
    %114 = tpu.matmul %110, %113, %cst_49 {dimension_numbers = #tpu.dot_dimension_numbers<[1], [0], [0], [1], [0, 0, 1, 1], [], []>} : vector<16x128xf32>, vector<128x128xf32>, vector<16x128xf32> -> vector<16x128xf32>
    %c2_50 = arith.constant 2 : index
    %c0_51 = arith.constant 0 : index
    %c0_52 = arith.constant 0 : index
    %115 = vector.load %arg3[%c2_50, %c0_51, %c0_52] : memref<4x128x8xf32, #tpu.memory_space<vmem>>, vector<1x128x8xf32>
    %116 = vector.shape_cast %115 : vector<1x128x8xf32> to vector<128x8xf32>
    %cst_53 = arith.constant dense<0.000000e+00> : vector<16x8xf32>
    %117 = tpu.matmul %114, %116, %cst_53 {dimension_numbers = #tpu.dot_dimension_numbers<[1], [0], [0], [1], [0, 0, 1, 1], [], []>} : vector<16x128xf32>, vector<128x8xf32>, vector<16x8xf32> -> vector<16x8xf32>
    %118 = tpu.transpose %117, [1, 0] : vector<16x8xf32> -> vector<8x16xf32>
    %119 = vector.extract_strided_slice %118 {offsets = [0, 0], sizes = [4, 16], strides = [1, 1]} : vector<8x16xf32> to vector<4x16xf32>
    %120 = vector.extract_strided_slice %118 {offsets = [4, 0], sizes = [4, 16], strides = [1, 1]} : vector<8x16xf32> to vector<4x16xf32>
    %121 = vector.shape_cast %120 : vector<4x16xf32> to vector<4x16x1xf32>
    %122 = vector.shape_cast %119 : vector<4x16xf32> to vector<4x1x16xf32>
    %123 = vector.broadcast %121 : vector<4x16x1xf32> to vector<4x16x16xf32>
    %124 = vector.broadcast %122 : vector<4x1x16xf32> to vector<4x16x16xf32>
    %125 = arith.addf %123, %124 : vector<4x16x16xf32>
    %126 = arith.addf %125, %111 : vector<4x16x16xf32>
    %cst_54 = arith.constant 2.000000e-01 : f32
    %127 = vector.broadcast %cst_54 : f32 to vector<4x16x16xf32>
    %128 = arith.mulf %127, %126 : vector<4x16x16xf32>
    %129 = arith.maximumf %126, %128 : vector<4x16x16xf32>
    %130 = vector.shape_cast %1 : vector<16x16xf32> to vector<1x16x16xf32>
    %131 = vector.broadcast %130 : vector<1x16x16xf32> to vector<4x16x16xf32>
    %132 = arith.addf %129, %131 : vector<4x16x16xf32>
    %cst_55 = arith.constant dense<0xFF800000> : vector<4x16xf32>
    %133 = vector.multi_reduction <maximumf>, %132, %cst_55 [2] : vector<4x16x16xf32> to vector<4x16xf32>
    %134 = vector.shape_cast %133 : vector<4x16xf32> to vector<4x16x1xf32>
    %135 = vector.broadcast %134 : vector<4x16x1xf32> to vector<4x16x16xf32>
    %136 = arith.subf %132, %135 : vector<4x16x16xf32>
    %137 = math.exp %136 : vector<4x16x16xf32>
    %cst_56 = arith.constant dense<0.000000e+00> : vector<4x16xf32>
    %138 = vector.multi_reduction <add>, %137, %cst_56 [2] : vector<4x16x16xf32> to vector<4x16xf32>
    %139 = vector.shape_cast %138 : vector<4x16xf32> to vector<4x16x1xf32>
    %140 = tpu.reciprocal %139 : vector<4x16x1xf32> -> vector<4x16x1xf32>
    %141 = vector.shape_cast %114 : vector<16x128xf32> to vector<1x16x128xf32>
    %142 = vector.broadcast %141 : vector<1x16x128xf32> to vector<4x16x128xf32>
    %143 = vector.broadcast %13 : vector<4x1x128xf32> to vector<4x16x128xf32>
    %144 = arith.mulf %142, %143 : vector<4x16x128xf32>
    "tpu.trace_start"() <{level = 10 : i32, message = "hij,hjk->hik"}> : () -> ()
    %cst_57 = arith.constant dense<0.000000e+00> : vector<4x16x128xf32>
    %145 = tpu.matmul %137, %144, %cst_57 {dimension_numbers = #tpu.dot_dimension_numbers<[2], [1], [1], [2], [0, 0, 0, 1, 1, 2], [0], [0]>} : vector<4x16x16xf32>, vector<4x16x128xf32>, vector<4x16x128xf32> -> vector<4x16x128xf32>
    "tpu.trace_stop"() : () -> ()
    %146 = vector.broadcast %140 : vector<4x16x1xf32> to vector<4x16x128xf32>
    %147 = arith.mulf %145, %146 : vector<4x16x128xf32>
    %cst_58 = arith.constant dense<0.000000e+00> : vector<16x128xf32>
    %148 = vector.multi_reduction <add>, %147, %cst_58 [0] : vector<4x16x128xf32> to vector<16x128xf32>
    %c2_59 = arith.constant 2 : index
    %c0_60 = arith.constant 0 : index
    %c0_61 = arith.constant 0 : index
    %149 = vector.load %arg4[%c2_59, %c0_60, %c0_61] : memref<4x1x128xf32, #tpu.memory_space<vmem>>, vector<1x1x128xf32>
    %150 = vector.shape_cast %149 : vector<1x1x128xf32> to vector<1x128xf32>
    %151 = vector.broadcast %150 : vector<1x128xf32> to vector<16x128xf32>
    %152 = arith.addf %148, %151 : vector<16x128xf32>
    %cst_62 = arith.constant 0.000000e+00 : f32
    %153 = vector.broadcast %cst_62 : f32 to vector<16x128xf32>
    %154 = arith.maximumf %152, %153 : vector<16x128xf32>
    %c12 = arith.constant 12 : index
    %c0_63 = arith.constant 0 : index
    %c0_64 = arith.constant 0 : index
    %155 = vector.load %arg1[%c12, %c0_63, %c0_64] : memref<17x16x16xf32, #tpu.memory_space<vmem>>, vector<4x16x16xf32>
    %c3 = arith.constant 3 : index
    %c0_65 = arith.constant 0 : index
    %c0_66 = arith.constant 0 : index
    %156 = vector.load %arg2[%c3, %c0_65, %c0_66] : memref<4x128x128xf32, #tpu.memory_space<vmem>>, vector<1x128x128xf32>
    %157 = vector.shape_cast %156 : vector<1x128x128xf32> to vector<128x128xf32>
    %cst_67 = arith.constant dense<0.000000e+00> : vector<16x128xf32>
    %158 = tpu.matmul %154, %157, %cst_67 {dimension_numbers = #tpu.dot_dimension_numbers<[1], [0], [0], [1], [0, 0, 1, 1], [], []>} : vector<16x128xf32>, vector<128x128xf32>, vector<16x128xf32> -> vector<16x128xf32>
    %c3_68 = arith.constant 3 : index
    %c0_69 = arith.constant 0 : index
    %c0_70 = arith.constant 0 : index
    %159 = vector.load %arg3[%c3_68, %c0_69, %c0_70] : memref<4x128x8xf32, #tpu.memory_space<vmem>>, vector<1x128x8xf32>
    %160 = vector.shape_cast %159 : vector<1x128x8xf32> to vector<128x8xf32>
    %cst_71 = arith.constant dense<0.000000e+00> : vector<16x8xf32>
    %161 = tpu.matmul %158, %160, %cst_71 {dimension_numbers = #tpu.dot_dimension_numbers<[1], [0], [0], [1], [0, 0, 1, 1], [], []>} : vector<16x128xf32>, vector<128x8xf32>, vector<16x8xf32> -> vector<16x8xf32>
    %162 = tpu.transpose %161, [1, 0] : vector<16x8xf32> -> vector<8x16xf32>
    %163 = vector.extract_strided_slice %162 {offsets = [0, 0], sizes = [4, 16], strides = [1, 1]} : vector<8x16xf32> to vector<4x16xf32>
    %164 = vector.extract_strided_slice %162 {offsets = [4, 0], sizes = [4, 16], strides = [1, 1]} : vector<8x16xf32> to vector<4x16xf32>
    %165 = vector.shape_cast %164 : vector<4x16xf32> to vector<4x16x1xf32>
    %166 = vector.shape_cast %163 : vector<4x16xf32> to vector<4x1x16xf32>
    %167 = vector.broadcast %165 : vector<4x16x1xf32> to vector<4x16x16xf32>
    %168 = vector.broadcast %166 : vector<4x1x16xf32> to vector<4x16x16xf32>
    %169 = arith.addf %167, %168 : vector<4x16x16xf32>
    %170 = arith.addf %169, %155 : vector<4x16x16xf32>
    %cst_72 = arith.constant 2.000000e-01 : f32
    %171 = vector.broadcast %cst_72 : f32 to vector<4x16x16xf32>
    %172 = arith.mulf %171, %170 : vector<4x16x16xf32>
    %173 = arith.maximumf %170, %172 : vector<4x16x16xf32>
    %174 = vector.shape_cast %1 : vector<16x16xf32> to vector<1x16x16xf32>
    %175 = vector.broadcast %174 : vector<1x16x16xf32> to vector<4x16x16xf32>
    %176 = arith.addf %173, %175 : vector<4x16x16xf32>
    %cst_73 = arith.constant dense<0xFF800000> : vector<4x16xf32>
    %177 = vector.multi_reduction <maximumf>, %176, %cst_73 [2] : vector<4x16x16xf32> to vector<4x16xf32>
    %178 = vector.shape_cast %177 : vector<4x16xf32> to vector<4x16x1xf32>
    %179 = vector.broadcast %178 : vector<4x16x1xf32> to vector<4x16x16xf32>
    %180 = arith.subf %176, %179 : vector<4x16x16xf32>
    %181 = math.exp %180 : vector<4x16x16xf32>
    %cst_74 = arith.constant dense<0.000000e+00> : vector<4x16xf32>
    %182 = vector.multi_reduction <add>, %181, %cst_74 [2] : vector<4x16x16xf32> to vector<4x16xf32>
    %183 = vector.shape_cast %182 : vector<4x16xf32> to vector<4x16x1xf32>
    %184 = tpu.reciprocal %183 : vector<4x16x1xf32> -> vector<4x16x1xf32>
    %185 = vector.shape_cast %158 : vector<16x128xf32> to vector<1x16x128xf32>
    %186 = vector.broadcast %185 : vector<1x16x128xf32> to vector<4x16x128xf32>
    %187 = vector.broadcast %13 : vector<4x1x128xf32> to vector<4x16x128xf32>
    %188 = arith.mulf %186, %187 : vector<4x16x128xf32>
    "tpu.trace_start"() <{level = 10 : i32, message = "hij,hjk->hik"}> : () -> ()
    %cst_75 = arith.constant dense<0.000000e+00> : vector<4x16x128xf32>
    %189 = tpu.matmul %181, %188, %cst_75 {dimension_numbers = #tpu.dot_dimension_numbers<[2], [1], [1], [2], [0, 0, 0, 1, 1, 2], [0], [0]>} : vector<4x16x16xf32>, vector<4x16x128xf32>, vector<4x16x128xf32> -> vector<4x16x128xf32>
    "tpu.trace_stop"() : () -> ()
    %190 = vector.broadcast %184 : vector<4x16x1xf32> to vector<4x16x128xf32>
    %191 = arith.mulf %189, %190 : vector<4x16x128xf32>
    %cst_76 = arith.constant dense<0.000000e+00> : vector<16x128xf32>
    %192 = vector.multi_reduction <add>, %191, %cst_76 [0] : vector<4x16x128xf32> to vector<16x128xf32>
    %c3_77 = arith.constant 3 : index
    %c0_78 = arith.constant 0 : index
    %c0_79 = arith.constant 0 : index
    %193 = vector.load %arg4[%c3_77, %c0_78, %c0_79] : memref<4x1x128xf32, #tpu.memory_space<vmem>>, vector<1x1x128xf32>
    %194 = vector.shape_cast %193 : vector<1x1x128xf32> to vector<1x128xf32>
    %195 = vector.broadcast %194 : vector<1x128xf32> to vector<16x128xf32>
    %196 = arith.addf %192, %195 : vector<16x128xf32>
    %cst_80 = arith.constant dense<0.000000e+00> : vector<16x32xf32>
    %197 = tpu.matmul %196, %21, %cst_80 {dimension_numbers = #tpu.dot_dimension_numbers<[1], [0], [0], [1], [0, 0, 1, 1], [], []>} : vector<16x128xf32>, vector<128x32xf32>, vector<16x32xf32> -> vector<16x32xf32>
    %cst_81 = arith.constant 0.000000e+00 : f32
    %198 = vector.broadcast %cst_81 : f32 to vector<16x32xf32>
    %199 = arith.maximumf %197, %198 : vector<16x32xf32>
    %c0_82 = arith.constant 0 : index
    %c0_83 = arith.constant 0 : index
    %200 = vector.load %arg5[%c0_82, %c0_83] : memref<2x16xf32, #tpu.memory_space<vmem>>, vector<2x16xf32>
    %cst_84 = arith.constant dense<0.000000e+00> : vector<2x32xf32>
    %201 = tpu.matmul %200, %199, %cst_84 {dimension_numbers = #tpu.dot_dimension_numbers<[1], [0], [0], [1], [0, 0, 1, 1], [], []>} : vector<2x16xf32>, vector<16x32xf32>, vector<2x32xf32> -> vector<2x32xf32>
    %c0_85 = arith.constant 0 : index
    %c0_86 = arith.constant 0 : index
    %202 = vector.load %arg6[%c0_85, %c0_86] : memref<32x1xf32, #tpu.memory_space<vmem>>, vector<32x1xf32>
    %cst_87 = arith.constant dense<0.000000e+00> : vector<2x1xf32>
    %203 = tpu.matmul %201, %202, %cst_87 {dimension_numbers = #tpu.dot_dimension_numbers<[1], [0], [0], [1], [0, 0, 1, 1], [], []>} : vector<2x32xf32>, vector<32x1xf32>, vector<2x1xf32> -> vector<2x1xf32>
    %c0_88 = arith.constant 0 : index
    %c0_89 = arith.constant 0 : index
    %204 = vector.load %arg7[%c0_88, %c0_89] : memref<2x1xf32, #tpu.memory_space<vmem>>, vector<2x1xf32>
    %205 = arith.addf %203, %204 : vector<2x1xf32>
    %cst_90 = arith.constant 0.000000e+00 : f32
    %206 = vector.broadcast %cst_90 : f32 to vector<2x1xf32>
    %207 = arith.subf %206, %205 : vector<2x1xf32>
    %208 = math.exp %207 : vector<2x1xf32>
    %cst_91 = arith.constant 1.000000e+00 : f32
    %209 = vector.broadcast %cst_91 : f32 to vector<2x1xf32>
    %210 = arith.addf %209, %208 : vector<2x1xf32>
    %cst_92 = arith.constant 1.000000e+00 : f32
    %211 = vector.broadcast %cst_92 : f32 to vector<2x1xf32>
    %212 = arith.divf %211, %210 : vector<2x1xf32>
    %c0_93 = arith.constant 0 : index
    %c0_94 = arith.constant 0 : index
    %213 = vector.load %arg8[%c0_93, %c0_94] : memref<2x1xf32, #tpu.memory_space<vmem>>, vector<2x1xf32>
    tpu.vector_store %arg8[%c0_93, %c0_94], %212 {strides = array<i32>} : memref<2x1xf32, #tpu.memory_space<vmem>>, vector<2x1xf32>,
    return
  }
}

</mosaic_0001>

<bundles_post_ra>
// kernel: gat_optuna_forward.1
= control target key start
LH: loop header
LB: loop body
LE: loop exit
PB: predicated region body
PF: predicated region fallthrough
CT: control target
= control target key end

     0   :  { %v32_v50 = vlaneseq  ;;  %v4880_v52 = vmov 0.0   ;;  %vm468_vm8 = vcmask 130048   ;;  %s5814_s2 = inlined_call_operand.vmem [shape: f32[4,128,128], index: 2, kind: input, shape index: {}]   ;;  %s5815_s0 = inlined_call_operand.vmem [shape: f32[16,128], index: 0, kind: input, shape index: {}]   ;;  %s5816_s3 = inlined_call_operand.vmem [shape: f32[4,128,8], index: 3, kind: input, shape index: {}]   ;;  %s5817_s1 = inlined_call_operand.vmem [shape: f32[17,16,16], index: 1, kind: input, shape index: {}]   ;;  %s5818_s4 = inlined_call_operand.vmem [shape: f32[4,1,128], index: 4, kind: input, shape index: {}]   ;;  %s5819_s6 = inlined_call_operand.vmem [shape: f32[32,1], index: 6, kind: input, shape index: {}]   ;;  %s5820_s5 = inlined_call_operand.vmem [shape: f32[2,16], index: 5, kind: input, shape index: {}]   ;;  %s5821_s7 = inlined_call_operand.vmem [shape: f32[2,1], index: 7, kind: input, shape index: {}]   ;;  %s5822_s8 = inlined_call_operand.vmem [shape: f32[2,1], index: 8, kind: output, shape index: {}]  }
   0x1   :  { %v125_v0 = vld [vmem:[%s5814_s2] sm:$0xff]  ;;  %v126_v1 = vld [vmem:[%s5814_s2 + $0x8] sm:$0xff]  ;;  %v127_v2 = vld [vmem:[%s5814_s2 + $0x10] sm:$0xff] }
   0x2   :  { %v4380_v3 = vpack.c.bf16 %v126_v1, %v125_v0  ;;  %v128_v4 = vld [vmem:[%s5814_s2 + $0x18] sm:$0xff]  ;;  %v129_v6 = vld [vmem:[%s5814_s2 + $0x20] sm:$0xff]  ;;  %v130_v7 = vld [vmem:[%s5814_s2 + $0x28] sm:$0xff]  ;;  %v5032_v51 = vand.u32 127, %v32_v50 }
   0x3   :  { %v4384_v5 = vpack.c.bf16 %v128_v4, %v127_v2  ;;  %v4388_v8 = vpack.c.bf16 %v130_v7, %v129_v6  ;;  %v131_v9 = vld [vmem:[%s5814_s2 + $0x30] sm:$0xff]  ;;  %v132_v10 = vld [vmem:[%s5814_s2 + $0x38] sm:$0xff]  ;;  %v115_v11 = vld [vmem:[%s5815_s0] sm:$0xff] }
   0x4   :  { %4381 = vmatprep.subr.bf16.mxu0 %v4380_v3  ;;  %3967 = vmatprep.mubr.f32.mxu0 %v115_v11  ;;  %v216_v12 = vld [vmem:[%s5816_s3] sm:$0xff]  ;;  %v217_v13 = vld [vmem:[%s5816_s3 + $0x8] sm:$0xff]  ;;  %v218_v14 = vld [vmem:[%s5816_s3 + $0x10] sm:$0xff]  ;;  %v4392_v20 = vpack.c.bf16 %v132_v10, %v131_v9  ;;  %vm35_vm0 = vcmp.ge.s32.totalorder %v5032_v51, 32  ;;  %vm39_vm1 = vcmp.lt.s32.totalorder %v5032_v51, 64  ;;  %vm36_vm2 = vcmp.ge.s32.totalorder %v5032_v51, 64 }
   0x5   :  { %4383 = vmatpush3.bf16.msra.mxu0 %v4380_v3  ;;  %v4412_v15 = vpack.c.bf16 %v217_v13, %v216_v12  ;;  %v219_v16 = vld [vmem:[%s5816_s3 + $0x18] sm:$0xff]  ;;  %v220_v18 = vld [vmem:[%s5816_s3 + $0x20] sm:$0xff]  ;;  %v221_v19 = vld [vmem:[%s5816_s3 + $0x28] sm:$0xff]  ;;  %vm40_vm3 = vcmp.lt.s32.totalorder %v5032_v51, 96  ;;  %vm38_vm5 = vcmp.lt.s32.totalorder %v5032_v51, 32  ;;  %vm37_vm7 = vcmp.ge.s32.totalorder %v5032_v51, 96 }
   0x6   :  { %4385 = vmatprep.subr.bf16.mxu0 %v4384_v5  ;;  %v4416_v17 = vpack.c.bf16 %v219_v16, %v218_v14  ;;  %v133_v21 = vld [vmem:[%s5814_s2 + $0x40] sm:$0xff]  ;;  %v134_v22 = vld [vmem:[%s5814_s2 + $0x48] sm:$0xff]  ;;  %v4420_v23 = vpack.c.bf16 %v221_v19, %v220_v18  ;;  %v222_v24 = vld [vmem:[%s5816_s3 + $0x30] sm:$0xff]  ;;  %v5041_v53 = vsel %vm38_vm5, 1.0, %v4880_v52  ;;  %v5050_v56 = vsel %vm37_vm7, 1.0, %v4880_v52 }
   0x7   :  { %4413 = vmatprep.subr.bf16.mxu1 %v4412_v15  ;;  %v223_v25 = vld [vmem:[%s5816_s3 + $0x38] sm:$0xff]  ;;  %v4396_v26 = vpack.c.bf16 %v134_v22, %v133_v21  ;;  %v135_v27 = vld [vmem:[%s5814_s2 + $0x50] sm:$0xff]  ;;  %v224_v30 = vld [vmem:[%s5816_s3 + $0x40] sm:$0xff]  ;;  %v5067_v9 = vshrl.u32 %v32_v50, 7  ;;  %v4881_v19 = vmov 1966171168  }
   0x8   :  { %4415 = vmatpush3.bf16.msra.mxu1 %v4412_v15  ;;  %v136_v28 = vld [vmem:[%s5814_s2 + $0x58] sm:$0xff]  ;;  %v4424_v29 = vpack.c.bf16 %v223_v25, %v222_v24  ;;  %v225_v31 = vld [vmem:[%s5816_s3 + $0x48] sm:$0xff]  ;;  %v137_v33 = vld [vmem:[%s5814_s2 + $0x60] sm:$0xff] }
   0x9   :  { %4387 = vmatpush3.bf16.msra.mxu0 %v4384_v5  ;;  %4417 = vmatprep.subr.bf16.mxu1 %v4416_v17  ;;  %v4400_v32 = vpack.c.bf16 %v136_v28, %v135_v27  ;;  %v138_v34 = vld [vmem:[%s5814_s2 + $0x68] sm:$0xff]  ;;  %v4428_v35 = vpack.c.bf16 %v225_v31, %v224_v30  ;;  %v226_v36 = vld [vmem:[%s5816_s3 + $0x50] sm:$0xff]  ;;  %v227_v37 = vld [vmem:[%s5816_s3 + $0x58] sm:$0xff]  ;;  %v5070_v10 = vsub.s32 5, %v5067_v9  ;;  %v5073_v11 = vsub.s32 4, %v5067_v9 }
   0xa   :  { %4389 = vmatprep.subr.bf16.mxu0 %v4388_v8  ;;  %v4404_v38 = vpack.c.bf16 %v138_v34, %v137_v33  ;;  %v139_v39 = vld [vmem:[%s5814_s2 + $0x70] sm:$0xff]  ;;  %v140_v40 = vld [vmem:[%s5814_s2 + $0x78] sm:$0xff]  ;;  %v4432_v41 = vpack.c.bf16 %v227_v37, %v226_v36  ;;  %v228_v42 = vld [vmem:[%s5816_s3 + $0x60] sm:$0xff]  ;;  %v5078_v15 = vsub.s32 6, %v5067_v9 }
   0xb   :  { %v229_v43 = vld [vmem:[%s5816_s3 + $0x68] sm:$0xff]  ;;  %v4408_v44 = vpack.c.bf16 %v140_v40, %v139_v39  ;;  %v230_v46 = vld [vmem:[%s5816_s3 + $0x70] sm:$0xff]  ;;  %v231_v47 = vld [vmem:[%s5816_s3 + $0x78] sm:$0xff] }
   0xc   :  { %4419 = vmatpush3.bf16.msra.mxu1 %v4416_v17  ;;  %v4436_v45 = vpack.c.bf16 %v229_v43, %v228_v42  ;;  %v4440_v48 = vpack.c.bf16 %v231_v47, %v230_v46  ;;  %v116_v49 = vld [vmem:[%s5815_s0 + $0x8] sm:$0xff]  ;;  %vm43_vm4 = vmand %vm35_vm0, %vm39_vm1  ;;  %v5082_v17 = vsub.s32 7, %v5067_v9  ;;  %v119_v30 = vld [vmem:[%s5817_s1 + $0x10] sm:$0xff] }
   0xd   :  { %4391 = vmatpush3.bf16.msra.mxu0 %v4388_v8  ;;  %4421 = vmatprep.subr.bf16.mxu1 %v4420_v23  ;;  %vm44_vm6 = vmand %vm36_vm2, %vm40_vm3  ;;  %v5044_v54 = vsel %vm43_vm4, 1.0, %v4880_v52  ;;  %v5108_v43 = vld [vmem:[%s5817_s1 + $0x100] sm:$0xff] }
   0xe   :  { %4393 = vmatprep.subr.bf16.mxu0 %v4392_v20  ;;  %v5047_v55 = vsel %vm44_vm6, 1.0, %v4880_v52 }
  0x10   :  { %4423 = vmatpush3.bf16.msra.mxu1 %v4420_v23 }
  0x11   :  { %4395 = vmatpush3.bf16.msra.mxu0 %v4392_v20  ;;  %4425 = vmatprep.subr.bf16.mxu1 %v4424_v29  ;;  %v385_v20 = vunpack.c.l.s4 %v4881_v19  ;;  %v122_v19 = vld [vmem:[%s5817_s1 + $0x28] sm:$0xff] }
  0x12   :  { %4397 = vmatprep.subr.bf16.mxu0 %v4396_v26 }
  0x13   :  { %v386_v21 = vunpack.c.0.s8 %v385_v20 }
  0x14   :  { %4427 = vmatpush3.bf16.msra.mxu1 %v4424_v29 }
  0x15   :  { %4399 = vmatpush3.bf16.msra.mxu0 %v4396_v26  ;;  %4429 = vmatprep.subr.bf16.mxu1 %v4428_v35  ;;  %v5086_v22 = vsub.s32 %v386_v21, %v5067_v9  ;;  %v5091_v26 = vsub.s32 0, %v5067_v9 }
  0x16   :  { %4401 = vmatprep.subr.bf16.mxu0 %v4400_v32 }
  0x18   :  { %4431 = vmatpush3.bf16.msra.mxu1 %v4428_v35 }
  0x19   :  { %4403 = vmatpush3.bf16.msra.mxu0 %v4400_v32  ;;  %4433 = vmatprep.subr.bf16.mxu1 %v4432_v41  ;;  %v117_v32 = vld [vmem:[%s5817_s1] sm:$0xff] }
  0x1a   :  { %4405 = vmatprep.subr.bf16.mxu0 %v4404_v38 }
  0x1c   :  { %4435 = vmatpush3.bf16.msra.mxu1 %v4432_v41 }
  0x1d   :  { %4407 = vmatpush3.bf16.msra.mxu0 %v4404_v38  ;;  %4437 = vmatprep.subr.bf16.mxu1 %v4436_v45  ;;  %v118_v38 = vld [vmem:[%s5817_s1 + $0x8] sm:$0xff] }
  0x1e   :  { %4409 = vmatprep.subr.bf16.mxu0 %v4408_v44 }
  0x20   :  { %4439 = vmatpush3.bf16.msra.mxu1 %v4436_v45 }
  0x21   :  { %4411 = vmatpush3.bf16.msra.mxu0 %v4408_v44  ;;  %4441 = vmatprep.subr.bf16.mxu1 %v4440_v48 }
  0x24   :  { %3968 = vmatmul.mubr.f32.vlgmr.msra.gmra.mrb[0].mxu0 %v116_v49  ;;  %4443 = vmatpush3.bf16.msra.mxu1 %v4440_v48  ;;  %v120_v48 = vld [vmem:[%s5817_s1 + $0x18] sm:$0xff] }
  0xf7   :  { %v3969_v57 = vpop.f32.mrb[0].mxu0 }
  0xf8   :  { %v207_v58 = vpop.f32.mrb[1].mxu0  ;;  %v550_v59 = vmul.f32 %v3969_v57, %v5041_v53  ;;  %v552_v60 = vmul.f32 %v3969_v57, %v5044_v54  ;;  %v554_v61 = vmul.f32 %v3969_v57, %v5047_v55  ;;  %v556_v62 = vmul.f32 %v3969_v57, %v5050_v56 }
  0xf9   :  { %4002 = vmatprep.mubr.f32.mxu1 %v207_v58  ;;  %v549_v63 = vmul.f32 %v207_v58, %v5041_v53  ;;  %v551_v0 = vmul.f32 %v207_v58, %v5044_v54  ;;  %v553_v1 = vmul.f32 %v207_v58, %v5047_v55  ;;  %v555_v2 = vmul.f32 %v207_v58, %v5050_v56 }
  0xfa   :  { %4003 = vmatmul.mubr.f32.vlgmr.msra.gmra.mrb[0].mxu1 %v3969_v57 }
  0xfb   :  { %v4444_v3 = vpack.c.bf16 %v550_v59, %v549_v63  ;;  %v5060_v4 = vpack.c.bf16 %v552_v60, %v551_v0  ;;  %v5062_v5 = vpack.c.bf16 %v554_v61, %v553_v1  ;;  %v5064_v6 = vpack.c.bf16 %v556_v62, %v555_v2  ;;  %v5118_v60 = vld [vmem:[%s5817_s1 + $0x108] sm:$0xff]  ;;  %v121_v1 = vld [vmem:[%s5817_s1 + $0x20] sm:$0xff] }
  0xfd   :  { %4445 = vmatprep.subr.bf16.mxu1 %v4444_v3 }
  0xfe   :  { %4447 = vmatpush3.bf16.msra.mxu1 %v4444_v3 }
  0xff   :  { %4449 = vmatprep.subr.bf16.mxu1 %v5060_v4 }
 0x1cd   :  { %v4004_v7 = vpop.f32.mrb[0].mxu1 }
 0x1ce   :  { %v298_v8 = vpop.f32.mrb[1].mxu1 }
 0x1cf   :  { %307 = vxpose.xlu0.b32.start [1/2] (short) (narrow) %v298_v8, 8 }
 0x1d3   :  { %308 = vxpose.xlu0.b32.end [2/2] (short) (narrow) %v4004_v7, 8 }
 0x24f   :  { %v323_v12 = vpop.trf.xlu0 }
 0x250   :  { %v353_v13 = vrot.slane %v323_v12, %v5070_v10  ;;  %v342_v14 = vrot.slane %v323_v12, %v5073_v11  ;;  %v364_v16 = vrot.slane %v323_v12, %v5078_v15  ;;  %v375_v18 = vrot.slane %v323_v12, %v5082_v17 }
 0x251   :  { %v390_v23 = vrot.slane %v323_v12, %v5086_v22 }
 0x252   :  { %355 = vbcast.lane.b32.xlu0 %v353_v13, 256  ;;  %344 = vbcast.lane.b32.xlu1 %v342_v14, 256 }
 0x253   :  { %v391_v24 = vcombine.high %v390_v23, %v390_v23  ;;  %v398_v27 = vrot.slane %v390_v23, %v5086_v22 }
 0x255   :  { %v405_v25 = vrot.slane %v391_v24, %v5086_v22  ;;  %v411_v29 = vrot.slane %v398_v27, %v5091_v26  ;;  %v406_v44 = vcombine.high %v398_v27, %v398_v27 }
 0x256   :  { %348 = vbcast.lane.b32.xlu1 %v342_v14, 264 }
 0x257   :  { %v415_v28 = vrot.slane %v405_v25, %v5091_v26  ;;  %v419_v59 = vrot.slane %v406_v44, %v5091_v26  ;;  %v407_v12 = vcombine.high %v405_v25, %v405_v25 }
 0x25a   :  { %359 = vbcast.lane.b32.xlu1 %v353_v13, 264 }
 0x25e   :  { %366 = vbcast.lane.b32.xlu1 %v364_v16, 256 }
 0x262   :  { %370 = vbcast.lane.b32.xlu1 %v364_v16, 264 }
 0x266   :  { %377 = vbcast.lane.b32.xlu1 %v375_v18, 256 }
 0x26a   :  { %381 = vbcast.lane.b32.xlu1 %v375_v18, 264 }
 0x2c4   :  { %v356_v31 = vpop.permute.xlu0 %355  ;;  %v345_v33 = vpop.permute.xlu1 %344 }
 0x2c5   :  { %v430_v34 = vadd.f32 %v415_v28, %v356_v31  ;;  %v428_v35 = vadd.f32 %v411_v29, %v345_v33 }
 0x2c7   :  { %v438_v36 = vadd.f32 %v430_v34, %v119_v30  ;;  %v436_v37 = vadd.f32 %v428_v35, %v117_v32  ;;  %v123_v30 = vld [vmem:[%s5817_s1 + $0x30] sm:$0xff] }
 0x2c8   :  { %v349_v39 = vpop.permute.xlu1 %348 }
 0x2c9   :  { %v446_v40 = vmul.f32 0.2, %v438_v36  ;;  %v444_v41 = vmul.f32 0.2, %v436_v37  ;;  %v429_v42 = vadd.f32 %v411_v29, %v349_v39 }
 0x2cb   :  { %v437_v45 = vadd.f32 %v429_v42, %v118_v38  ;;  %v452_v46 = vmax.f32 %v436_v37, %v444_v41  ;;  %v454_v47 = vmax.f32 %v438_v36, %v446_v40  ;;  %v124_v38 = vld [vmem:[%s5817_s1 + $0x38] sm:$0xff] }
 0x2cc   :  { %v360_v49 = vpop.permute.xlu1 %359 }
 0x2cd   :  { %v445_v50 = vmul.f32 0.2, %v437_v45  ;;  %v431_v57 = vadd.f32 %v415_v28, %v360_v49  ;;  %v460_v58 = vadd.f32 %v5108_v43, %v452_v46  ;;  %v462_v63 = vadd.f32 %v5108_v43, %v454_v47 }
 0x2ce   :  { %v423_v28 = vrot.slane %v407_v12, %v5091_v26 }
 0x2cf   :  { %v439_v61 = vadd.f32 %v431_v57, %v120_v48  ;;  %v469_v62 = vsel %vm468_vm8, %v460_v58, -inf  ;;  %v453_v0 = vmax.f32 %v437_v45, %v445_v50  ;;  %v475_v14 = vsel %vm468_vm8, %v462_v63, -inf }
 0x2d0   :  { %470 = vmax.xlane.f32.xlu1 %v469_v62  ;;  %v367_v2 = vpop.permute.xlu1 %366 }
 0x2d1   :  { %v447_v3 = vmul.f32 0.2, %v439_v61  ;;  %v432_v7 = vadd.f32 %v419_v59, %v367_v2  ;;  %v461_v8 = vadd.f32 %v5118_v60, %v453_v0 }
 0x2d3   :  { %v440_v13 = vadd.f32 %v432_v7, %v121_v1  ;;  %v472_v16 = vsel %vm468_vm8, %v461_v8, -inf  ;;  %v455_v18 = vmax.f32 %v439_v61, %v447_v3 }
 0x2d4   :  { %476 = vmax.xlane.f32.xlu1 %v475_v14  ;;  %473 = vmax.xlane.f32.xlu0 %v472_v16  ;;  %v371_v20 = vpop.permute.xlu1 %370 }
 0x2d5   :  { %v448_v21 = vmul.f32 0.2, %v440_v13  ;;  %v433_v23 = vadd.f32 %v419_v59, %v371_v20  ;;  %v463_v24 = vadd.f32 %v5118_v60, %v455_v18 }
 0x2d7   :  { %v441_v27 = vadd.f32 %v433_v23, %v122_v19  ;;  %v478_v25 = vsel %vm468_vm8, %v463_v24, -inf  ;;  %v456_v29 = vmax.f32 %v440_v13, %v448_v21 }
 0x2d8   :  { %479 = vmax.xlane.f32.xlu1 %v478_v25  ;;  %v378_v31 = vpop.permute.xlu1 %377 }
 0x2d9   :  { %v449_v32 = vmul.f32 0.2, %v441_v27  ;;  %v434_v33 = vadd.f32 %v423_v28, %v378_v31  ;;  %v464_v34 = vadd.f32 %v5108_v43, %v456_v29 }
 0x2db   :  { %v442_v35 = vadd.f32 %v434_v33, %v123_v30  ;;  %v481_v36 = vsel %vm468_vm8, %v464_v34, -inf  ;;  %v457_v37 = vmax.f32 %v441_v27, %v449_v32 }
 0x2dc   :  { %482 = vmax.xlane.f32.xlu1 %v481_v36  ;;  %v382_v39 = vpop.permute.xlu1 %381 }
 0x2dd   :  { %v450_v40 = vmul.f32 0.2, %v442_v35  ;;  %v435_v41 = vadd.f32 %v423_v28, %v382_v39  ;;  %v465_v42 = vadd.f32 %v5118_v60, %v457_v37 }
 0x2df   :  { %v443_v44 = vadd.f32 %v435_v41, %v124_v38  ;;  %v484_v45 = vsel %vm468_vm8, %v465_v42, -inf  ;;  %v458_v46 = vmax.f32 %v442_v35, %v450_v40 }
 0x2e0   :  { %485 = vmax.xlane.f32.xlu1 %v484_v45  ;;  %v3541_v45 = vld [vmem:[%s5814_s2 + $0x80] sm:$0xff] }
 0x2e1   :  { %v451_v47 = vmul.f32 0.2, %v443_v44  ;;  %v466_v48 = vadd.f32 %v5108_v43, %v458_v46 }
 0x2e3   :  { %v487_v49 = vsel %vm468_vm8, %v466_v48, -inf  ;;  %v459_v50 = vmax.f32 %v443_v44, %v451_v47  ;;  %v3543_v47 = vld [vmem:[%s5814_s2 + $0x90] sm:$0xff] }
 0x2e4   :  { %488 = vmax.xlane.f32.xlu0 %v487_v49 }
 0x2e5   :  { %v467_v57 = vadd.f32 %v5118_v60, %v459_v50  ;;  %v3545_v50 = vld [vmem:[%s5814_s2 + $0xa0] sm:$0xff] }
 0x2e7   :  { %v490_v59 = vsel %vm468_vm8, %v467_v57, -inf }
 0x2e8   :  { %491 = vmax.xlane.f32.xlu1 %v490_v59 }
 0x35d   :  { %v471_v61 = vpop.xlane.xlu1 %470 }
 0x35e   :  { %v493_v62 = vsub.f32 %v460_v58, %v471_v61  ;;  %v3547_v61 = vld [vmem:[%s5814_s2 + $0xb0] sm:$0xff] }
 0x360   :  { %v501_v0 = vmul.f32 1.442695, %v493_v62  ;;  %v3548_v62 = vld [vmem:[%s5814_s2 + $0xb8] sm:$0xff] }
 0x361   :  { %v474_v1 = vpop.xlane.xlu0 %473  ;;  %v477_v2 = vpop.xlane.xlu1 %476 }
 0x362   :  { %4746 = vpow2.f32 %v501_v0  ;;  %v494_v3 = vsub.f32 %v461_v8, %v474_v1  ;;  %v495_v7 = vsub.f32 %v462_v63, %v477_v2  ;;  %v4472_v0 = vpack.c.bf16 %v3548_v62, %v3547_v61  ;;  %v3549_v1 = vld [vmem:[%s5814_s2 + $0xc0] sm:$0xff]  ;;  %v3550_v2 = vld [vmem:[%s5814_s2 + $0xc8] sm:$0xff] }
 0x364   :  { %v503_v12 = vmul.f32 1.442695, %v494_v3  ;;  %v505_v13 = vmul.f32 1.442695, %v495_v7  ;;  %v4476_v3 = vpack.c.bf16 %v3550_v2, %v3549_v1  ;;  %v3551_v7 = vld [vmem:[%s5814_s2 + $0xd0] sm:$0xff] }
 0x365   :  { %v480_v14 = vpop.xlane.xlu1 %479 }
 0x366   :  { %4748 = vpow2.f32 %v503_v12  ;;  %v496_v16 = vsub.f32 %v463_v24, %v480_v14  ;;  %v3552_v12 = vld [vmem:[%s5814_s2 + $0xd8] sm:$0xff]  ;;  %v3553_v14 = vld [vmem:[%s5814_s2 + $0xe0] sm:$0xff] }
 0x367   :  { %4750 = vpow2.f32 %v505_v13  ;;  %v4480_v13 = vpack.c.bf16 %v3552_v12, %v3551_v7 }
 0x368   :  { %v507_v18 = vmul.f32 1.442695, %v496_v16  ;;  %v3554_v16 = vld [vmem:[%s5814_s2 + $0xe8] sm:$0xff] }
 0x369   :  { %v483_v19 = vpop.xlane.xlu1 %482 }
 0x36a   :  { %4752 = vpow2.f32 %v507_v18  ;;  %v497_v20 = vsub.f32 %v464_v34, %v483_v19  ;;  %v4484_v18 = vpack.c.bf16 %v3554_v16, %v3553_v14  ;;  %v3555_v19 = vld [vmem:[%s5814_s2 + $0xf0] sm:$0xff] }
 0x36c   :  { %v4747_v21 = vpop.eup %4746  ;;  %v509_v23 = vmul.f32 1.442695, %v497_v20  ;;  %v3556_v20 = vld [vmem:[%s5814_s2 + $0xf8] sm:$0xff] }
 0x36d   :  { %4009 = vmatprep.mubr.msk.f32.mxu1 %vm468_vm8, %v4747_v21  ;;  %v486_v58 = vpop.xlane.xlu1 %485  ;;  %v517_v27 = vsel %vm468_vm8, %v4747_v21, 0.0  ;;  %v4488_v21 = vpack.c.bf16 %v3556_v20, %v3555_v19 }
 0x36e   :  { %4754 = vpow2.f32 %v509_v23  ;;  %v498_v8 = vsub.f32 %v465_v42, %v486_v58  ;;  %518 = vadd.xlane.f32.xlu0 %v517_v27  ;;  %v3557_v23 = vld [vmem:[%s5816_s3 + $0x80] sm:$0xff]  ;;  %v3558_v58 = vld [vmem:[%s5816_s3 + $0x88] sm:$0xff]  ;;  %v3559_v27 = vld [vmem:[%s5816_s3 + $0x90] sm:$0xff] }
 0x370   :  { %v4749_v63 = vpop.eup %4748  ;;  %v511_v25 = vmul.f32 1.442695, %v498_v8  ;;  %v4492_v8 = vpack.c.bf16 %v3558_v58, %v3557_v23 }
 0x371   :  { %v4751_v28 = vpop.eup %4750  ;;  %v489_v29 = vpop.xlane.xlu0 %488  ;;  %4010 = vmatmul.mubr.msk.f32.vlgmr.msra.gmra.mrb[2].mxu1 %vm468_vm8, %v4749_v63  ;;  %v520_v24 = vsel %vm468_vm8, %v4749_v63, 0.0  ;;  %v3560_v63 = vld [vmem:[%s5816_s3 + $0x98] sm:$0xff] }
 0x372   :  { %4756 = vpow2.f32 %v511_v25  ;;  %v499_v30 = vsub.f32 %v466_v48, %v489_v29  ;;  %4451 = vmatpush3.bf16.msra.mxu1 %v5060_v4  ;;  %521 = vadd.xlane.f32.xlu0 %v520_v24  ;;  %v523_v31 = vsel %vm468_vm8, %v4751_v28, 0.0  ;;  %v3544_v48 = vld [vmem:[%s5814_s2 + $0x98] sm:$0xff]  ;;  %v4496_v25 = vpack.c.bf16 %v3560_v63, %v3559_v27  ;;  %v3562_v29 = vld [vmem:[%s5816_s3 + $0xa8] sm:$0xff] }
 0x373   :  { %4453 = vmatprep.subr.bf16.mxu1 %v5062_v5  ;;  %4016 = vmatprep.mubr.msk.f32.mxu1 %vm468_vm8, %v4751_v28  ;;  %v4464_v49 = vpack.c.bf16 %v3544_v48, %v3543_v47  ;;  %v3561_v28 = vld [vmem:[%s5816_s3 + $0xa0] sm:$0xff] }
 0x374   :  { %v4753_v32 = vpop.eup %4752  ;;  %v513_v33 = vmul.f32 1.442695, %v499_v30  ;;  %524 = vadd.xlane.f32.xlu1 %v523_v31  ;;  %v4500_v24 = vpack.c.bf16 %v3562_v29, %v3561_v28  ;;  %v3563_v30 = vld [vmem:[%s5816_s3 + $0xb0] sm:$0xff]  ;;  %v3564_v31 = vld [vmem:[%s5816_s3 + $0xb8] sm:$0xff] }
 0x375   :  { %4017 = vmatmul.mubr.msk.f32.vlgmr.msra.gmra.mrb[4].mxu1 %vm468_vm8, %v4753_v32  ;;  %v492_v34 = vpop.xlane.xlu1 %491  ;;  %v526_v35 = vsel %vm468_vm8, %v4753_v32, 0.0  ;;  %v4504_v32 = vpack.c.bf16 %v3564_v31, %v3563_v30  ;;  %v3532_v31 = vld [vmem:[%s5818_s4] ss:$0 sm:$0xff] }
 0x376   :  { %4758 = vpow2.f32 %v513_v33  ;;  %4455 = vmatpush3.bf16.msra.mxu1 %v5062_v5  ;;  %v500_v36 = vsub.f32 %v467_v57, %v492_v34  ;;  %v3546_v57 = vld [vmem:[%s5814_s2 + $0xa8] sm:$0xff]  ;;  %v3565_v33 = vld [vmem:[%s5816_s3 + $0xc0] sm:$0xff] }
 0x377   :  { %4457 = vmatprep.subr.bf16.mxu1 %v5064_v6  ;;  %v4468_v59 = vpack.c.bf16 %v3546_v57, %v3545_v50  ;;  %v3566_v34 = vld [vmem:[%s5816_s3 + $0xc8] sm:$0xff] }
 0x378   :  { %v4755_v4 = vpop.eup %4754  ;;  %v515_v37 = vmul.f32 1.442695, %v500_v36  ;;  %527 = vadd.xlane.f32.xlu1 %v526_v35  ;;  %v4508_v35 = vpack.c.bf16 %v3566_v34, %v3565_v33  ;;  %v3567_v36 = vld [vmem:[%s5816_s3 + $0xd0] sm:$0xff] }
 0x379   :  { %4023 = vmatprep.mubr.msk.f32.mxu1 %vm468_vm8, %v4755_v4  ;;  %v529_v38 = vsel %vm468_vm8, %v4755_v4, 0.0  ;;  %v3568_v4 = vld [vmem:[%s5816_s3 + $0xd8] sm:$0xff] }
 0x37a   :  { %4760 = vpow2.f32 %v515_v37  ;;  %530 = vadd.xlane.f32.xlu0 %v529_v38  ;;  %v4512_v37 = vpack.c.bf16 %v3568_v4, %v3567_v36  ;;  %v3569_v38 = vld [vmem:[%s5816_s3 + $0xe0] sm:$0xff] }
 0x37c   :  { %v4757_v39 = vpop.eup %4756 }
 0x37d   :  { %4024 = vmatmul.mubr.msk.f32.vlgmr.msra.gmra.mrb[6].mxu1 %vm468_vm8, %v4757_v39  ;;  %v532_v40 = vsel %vm468_vm8, %v4757_v39, 0.0  ;;  %v3570_v39 = vld [vmem:[%s5816_s3 + $0xe8] sm:$0xff] }
 0x37e   :  { %4459 = vmatpush3.bf16.msra.mxu1 %v5064_v6  ;;  %533 = vadd.xlane.f32.xlu1 %v532_v40  ;;  %v3542_v6 = vld [vmem:[%s5814_s2 + $0x88] sm:$0xff]  ;;  %v4516_v40 = vpack.c.bf16 %v3570_v39, %v3569_v38 }
 0x37f   :  { %v4460_v46 = vpack.c.bf16 %v3542_v6, %v3541_v45  ;;  %4493 = vmatprep.subr.bf16.mxu1 %v4492_v8 }
 0x380   :  { %v4759_v5 = vpop.eup %4758 }
 0x381   :  { %4030 = vmatprep.mubr.msk.f32.mxu1 %vm468_vm8, %v4759_v5  ;;  %v535_v41 = vsel %vm468_vm8, %v4759_v5, 0.0  ;;  %4461 = vmatprep.subr.bf16.mxu0 %v4460_v46  ;;  %v3571_v5 = vld [vmem:[%s5816_s3 + $0xf0] sm:$0xff] }
 0x382   :  { %536 = vadd.xlane.f32.xlu0 %v535_v41  ;;  %4463 = vmatpush3.bf16.msra.mxu0 %v4460_v46  ;;  %v3572_v41 = vld [vmem:[%s5816_s3 + $0xf8] sm:$0xff] }
 0x383   :  { %4465 = vmatprep.subr.bf16.mxu0 %v4464_v49 }
 0x384   :  { %v4761_v42 = vpop.eup %4760 }
 0x385   :  { %4031 = vmatmul.mubr.msk.f32.vlgmr.msra.gmra.mrb[8].mxu1 %vm468_vm8, %v4761_v42  ;;  %v538_v44 = vsel %vm468_vm8, %v4761_v42, 0.0  ;;  %v4520_v42 = vpack.c.bf16 %v3572_v41, %v3571_v5 }
 0x386   :  { %539 = vadd.xlane.f32.xlu1 %v538_v44  ;;  %4467 = vmatpush3.bf16.msra.mxu0 %v4464_v49 }
 0x387   :  { %4469 = vmatprep.subr.bf16.mxu0 %v4468_v59  ;;  %4495 = vmatpush3.bf16.msra.mxu1 %v4492_v8 }
 0x388   :  { %4497 = vmatprep.subr.bf16.mxu1 %v4496_v25 }
 0x38a   :  { %4471 = vmatpush3.bf16.msra.mxu0 %v4468_v59 }
 0x38b   :  { %4473 = vmatprep.subr.bf16.mxu0 %v4472_v0  ;;  %4499 = vmatpush3.bf16.msra.mxu1 %v4496_v25 }
 0x38c   :  { %4501 = vmatprep.subr.bf16.mxu1 %v4500_v24 }
 0x38e   :  { %4475 = vmatpush3.bf16.msra.mxu0 %v4472_v0 }
 0x38f   :  { %4477 = vmatprep.subr.bf16.mxu0 %v4476_v3  ;;  %4503 = vmatpush3.bf16.msra.mxu1 %v4500_v24 }
 0x390   :  { %4505 = vmatprep.subr.bf16.mxu1 %v4504_v32 }
 0x392   :  { %4479 = vmatpush3.bf16.msra.mxu0 %v4476_v3 }
 0x393   :  { %4481 = vmatprep.subr.bf16.mxu0 %v4480_v13  ;;  %4507 = vmatpush3.bf16.msra.mxu1 %v4504_v32 }
 0x394   :  { %4509 = vmatprep.subr.bf16.mxu1 %v4508_v35 }
 0x396   :  { %4483 = vmatpush3.bf16.msra.mxu0 %v4480_v13 }
 0x397   :  { %4485 = vmatprep.subr.bf16.mxu0 %v4484_v18  ;;  %4511 = vmatpush3.bf16.msra.mxu1 %v4508_v35 }
 0x398   :  { %4513 = vmatprep.subr.bf16.mxu1 %v4512_v37 }
 0x39a   :  { %4487 = vmatpush3.bf16.msra.mxu0 %v4484_v18 }
 0x39b   :  { %4489 = vmatprep.subr.bf16.mxu0 %v4488_v21  ;;  %4515 = vmatpush3.bf16.msra.mxu1 %v4512_v37 }
 0x39c   :  { %4517 = vmatprep.subr.bf16.mxu1 %v4516_v40 }
 0x39e   :  { %4491 = vmatpush3.bf16.msra.mxu0 %v4488_v21 }
 0x39f   :  { %4519 = vmatpush3.bf16.msra.mxu1 %v4516_v40 }
 0x3a0   :  { %4521 = vmatprep.subr.bf16.mxu1 %v4520_v42 }
 0x3a3   :  { %4523 = vmatpush3.bf16.msra.mxu1 %v4520_v42 }
 0x3fb   :  { %v519_v44 = vpop.xlane.xlu0 %518 }
 0x3fc   :  { %4762 = vrcp.f32 %v519_v44 }
 0x3ff   :  { %v522_v6 = vpop.xlane.xlu0 %521 }
 0x400   :  { %4764 = vrcp.f32 %v522_v6 }
 0x401   :  { %v525_v45 = vpop.xlane.xlu1 %524 }
 0x405   :  { %v528_v46 = vpop.xlane.xlu1 %527 }
 0x406   :  { %4766 = vrcp.f32 %v528_v46  ;;  %v4763_v57 = vpop.eup %4762 }
 0x407   :  { %4768 = vrcp.f32 %v525_v45  ;;  %v531_v48 = vpop.xlane.xlu0 %530 }
 0x40a   :  { %v4765_v59 = vpop.eup %4764 }
 0x40b   :  { %v534_v47 = vpop.xlane.xlu1 %533 }
 0x40c   :  { %4770 = vrcp.f32 %v534_v47 }
 0x40d   :  { %4772 = vrcp.f32 %v531_v48 }
 0x40f   :  { %v537_v16 = vpop.xlane.xlu0 %536 }
 0x410   :  { %v4767_v61 = vpop.eup %4766 }
 0x411   :  { %v4769_v0 = vpop.eup %4768 }
 0x413   :  { %v540_v13 = vpop.xlane.xlu1 %539 }
 0x414   :  { %4774 = vrcp.f32 %v540_v13 }
 0x415   :  { %4776 = vrcp.f32 %v537_v16 }
 0x416   :  { %v4771_v19 = vpop.eup %4770 }
 0x417   :  { %v4773_v21 = vpop.eup %4772 }
 0x41e   :  { %v4775_v25 = vpop.eup %4774 }
 0x41f   :  { %v4777_v29 = vpop.eup %4776 }
 0x444   :  { %v4011_v49 = vpop.f32.mrb[2].mxu1 }
 0x445   :  { %v629_v50 = vpop.f32.mrb[3].mxu1  ;;  %v882_v1 = vmul.f32 %v4765_v59, %v4011_v49 }
 0x446   :  { %v881_v7 = vmul.f32 %v4763_v57, %v629_v50 }
 0x448   :  { %v4018_v62 = vpop.f32.mrb[4].mxu1 }
 0x449   :  { %v884_v2 = vmul.f32 %v4767_v61, %v4018_v62  ;;  %v710_v3 = vpop.f32.mrb[5].mxu1 }
 0x44a   :  { %v883_v12 = vmul.f32 %v4769_v0, %v710_v3 }
 0x44b   :  { %v892_v14 = vadd.f32 %v884_v2, %v882_v1 }
 0x44c   :  { %v889_v18 = vadd.f32 %v883_v12, %v881_v7 }
 0x450   :  { %v4025_v20 = vpop.f32.mrb[6].mxu1 }
 0x451   :  { %v886_v23 = vmul.f32 %v4771_v19, %v4025_v20  ;;  %v791_v58 = vpop.f32.mrb[7].mxu1 }
 0x452   :  { %v885_v27 = vmul.f32 %v4773_v21, %v791_v58  ;;  %v3534_v21 = vld [vmem:[%s5817_s1 + $0x48] sm:$0xff] }
 0x453   :  { %v893_v8 = vadd.f32 %v892_v14, %v886_v23  ;;  %v3533_v14 = vld [vmem:[%s5817_s1 + $0x40] sm:$0xff] }
 0x454   :  { %v890_v63 = vadd.f32 %v889_v18, %v885_v27 }
 0x458   :  { %v4032_v28 = vpop.f32.mrb[8].mxu1 }
 0x459   :  { %v888_v24 = vmul.f32 %v4775_v25, %v4032_v28  ;;  %v872_v30 = vpop.f32.mrb[9].mxu1  ;;  %v3535_v28 = vld [vmem:[%s5817_s1 + $0x50] sm:$0xff] }
 0x45a   :  { %v887_v32 = vmul.f32 %v4777_v29, %v872_v30 }
 0x45b   :  { %v894_v33 = vadd.f32 %v893_v8, %v888_v24 }
 0x45c   :  { %v891_v34 = vadd.f32 %v890_v63, %v887_v32 }
 0x45d   :  { %v903_v35 = vadd.f32 %v3532_v31, %v894_v33 }
 0x45e   :  { %v902_v36 = vadd.f32 %v3532_v31, %v891_v34 }
 0x45f   :  { %v905_v37 = vmax.f32 %v903_v35, 0.0 }
 0x460   :  { %v904_v4 = vmax.f32 %v902_v36, 0.0  ;;  %v3536_v36 = vld [vmem:[%s5817_s1 + $0x58] sm:$0xff] }
 0x462   :  { %4065 = vmatprep.mubr.f32.mxu0 %v904_v4 }
 0x463   :  { %4066 = vmatmul.mubr.f32.vlgmr.msra.gmra.mrb[2].mxu0 %v905_v37 }
 0x536   :  { %v4067_v38 = vpop.f32.mrb[2].mxu0 }
 0x537   :  { %v998_v39 = vpop.f32.mrb[3].mxu0  ;;  %v1341_v40 = vmul.f32 %v4067_v38, %v5041_v53  ;;  %v1343_v5 = vmul.f32 %v4067_v38, %v5044_v54  ;;  %v1345_v41 = vmul.f32 %v4067_v38, %v5047_v55  ;;  %v1347_v42 = vmul.f32 %v4067_v38, %v5050_v56 }
 0x538   :  { %4100 = vmatprep.mubr.f32.mxu1 %v998_v39  ;;  %v1340_v44 = vmul.f32 %v998_v39, %v5041_v53  ;;  %v1342_v45 = vmul.f32 %v998_v39, %v5044_v54  ;;  %v1344_v6 = vmul.f32 %v998_v39, %v5047_v55  ;;  %v1346_v46 = vmul.f32 %v998_v39, %v5050_v56 }
 0x539   :  { %4101 = vmatmul.mubr.f32.vlgmr.msra.gmra.mrb[10].mxu1 %v4067_v38 }
 0x53a   :  { %v4524_v47 = vpack.c.bf16 %v1341_v40, %v1340_v44  ;;  %v4528_v48 = vpack.c.bf16 %v1343_v5, %v1342_v45  ;;  %v5276_v49 = vpack.c.bf16 %v1345_v41, %v1344_v6  ;;  %v5278_v50 = vpack.c.bf16 %v1347_v42, %v1346_v46  ;;  %v3537_v44 = vld [vmem:[%s5817_s1 + $0x60] sm:$0xff] }
 0x53c   :  { %4525 = vmatprep.subr.bf16.mxu0 %v4524_v47  ;;  %4529 = vmatprep.subr.bf16.mxu1 %v4528_v48 }
 0x53d   :  { %4527 = vmatpush3.bf16.msra.mxu0 %v4524_v47  ;;  %4531 = vmatpush3.bf16.msra.mxu1 %v4528_v48 }
 0x53e   :  { %4533 = vmatprep.subr.bf16.mxu0 %v5276_v49  ;;  %4537 = vmatprep.subr.bf16.mxu1 %v5278_v50 }
 0x60c   :  { %v4102_v57 = vpop.f32.mrb[10].mxu1 }
 0x60d   :  { %v1090_v59 = vpop.f32.mrb[11].mxu1 }
 0x60e   :  { %1099 = vxpose.xlu0.b32.start [1/2] (short) (narrow) %v1090_v59, 8 }
 0x612   :  { %1100 = vxpose.xlu0.b32.end [2/2] (short) (narrow) %v4102_v57, 8 }
 0x68e   :  { %v1115_v61 = vpop.trf.xlu0 }
 0x68f   :  { %v1134_v62 = vrot.slane %v1115_v61, %v5073_v11  ;;  %v1145_v0 = vrot.slane %v1115_v61, %v5070_v10  ;;  %v1156_v1 = vrot.slane %v1115_v61, %v5078_v15  ;;  %v1167_v2 = vrot.slane %v1115_v61, %v5082_v17 }
 0x690   :  { %v1182_v3 = vrot.slane %v1115_v61, %v5086_v22 }
 0x691   :  { %1136 = vbcast.lane.b32.xlu1 %v1134_v62, 256 }
 0x692   :  { %v1190_v7 = vrot.slane %v1182_v3, %v5086_v22  ;;  %v1183_v13 = vcombine.high %v1182_v3, %v1182_v3 }
 0x694   :  { %v1203_v12 = vrot.slane %v1190_v7, %v5091_v26  ;;  %v1197_v20 = vrot.slane %v1183_v13, %v5086_v22  ;;  %v1198_v35 = vcombine.high %v1190_v7, %v1190_v7 }
 0x695   :  { %1140 = vbcast.lane.b32.xlu1 %v1134_v62, 264  ;;  %v3538_v62 = vld [vmem:[%s5817_s1 + $0x68] sm:$0xff] }
 0x696   :  { %v1207_v63 = vrot.slane %v1197_v20, %v5091_v26  ;;  %v1211_v41 = vrot.slane %v1198_v35, %v5091_v26  ;;  %v1199_v61 = vcombine.high %v1197_v20, %v1197_v20 }
 0x698   :  { %v1215_v13 = vrot.slane %v1199_v61, %v5091_v26 }
 0x699   :  { %1147 = vbcast.lane.b32.xlu1 %v1145_v0, 256 }
 0x69d   :  { %1151 = vbcast.lane.b32.xlu1 %v1145_v0, 264 }
 0x6a1   :  { %1158 = vbcast.lane.b32.xlu1 %v1156_v1, 256 }
 0x6a5   :  { %1162 = vbcast.lane.b32.xlu1 %v1156_v1, 264 }
 0x6a9   :  { %1169 = vbcast.lane.b32.xlu1 %v1167_v2, 256 }
 0x6ad   :  { %1173 = vbcast.lane.b32.xlu1 %v1167_v2, 264 }
 0x703   :  { %v1137_v16 = vpop.permute.xlu1 %1136 }
 0x704   :  { %v1220_v18 = vadd.f32 %v1203_v12, %v1137_v16  ;;  %v3539_v16 = vld [vmem:[%s5817_s1 + $0x70] sm:$0xff] }
 0x706   :  { %v1228_v19 = vadd.f32 %v3533_v14, %v1220_v18 }
 0x707   :  { %v1141_v23 = vpop.permute.xlu1 %1140 }
 0x708   :  { %v1236_v58 = vmul.f32 0.2, %v1228_v19  ;;  %v1221_v27 = vadd.f32 %v1203_v12, %v1141_v23 }
 0x70a   :  { %v1229_v8 = vadd.f32 %v3534_v21, %v1221_v27  ;;  %v1244_v25 = vmax.f32 %v1228_v19, %v1236_v58 }
 0x70b   :  { %v1148_v29 = vpop.permute.xlu1 %1147 }
 0x70c   :  { %v1237_v24 = vmul.f32 0.2, %v1229_v8  ;;  %v1222_v30 = vadd.f32 %v1207_v63, %v1148_v29  ;;  %v5301_v31 = vadd.f32 %v5108_v43, %v1244_v25 }
 0x70e   :  { %v1230_v32 = vadd.f32 %v3535_v28, %v1222_v30  ;;  %v1260_v33 = vsel %vm468_vm8, %v5301_v31, -inf  ;;  %v1245_v34 = vmax.f32 %v1229_v8, %v1237_v24  ;;  %v3540_v8 = vld [vmem:[%s5817_s1 + $0x78] sm:$0xff] }
 0x70f   :  { %1261 = vmax.xlane.f32.xlu1 %v1260_v33  ;;  %v1152_v4 = vpop.permute.xlu1 %1151 }
 0x710   :  { %v1238_v37 = vmul.f32 0.2, %v1230_v32  ;;  %v1223_v38 = vadd.f32 %v1207_v63, %v1152_v4  ;;  %v1253_v39 = vadd.f32 %v5118_v60, %v1245_v34 }
 0x712   :  { %v1231_v40 = vadd.f32 %v3536_v36, %v1223_v38  ;;  %v1263_v5 = vsel %vm468_vm8, %v1253_v39, -inf  ;;  %v1246_v42 = vmax.f32 %v1230_v32, %v1238_v37 }
 0x713   :  { %1264 = vmax.xlane.f32.xlu0 %v1263_v5  ;;  %v1159_v45 = vpop.permute.xlu1 %1158 }
 0x714   :  { %v1239_v6 = vmul.f32 0.2, %v1231_v40  ;;  %v1224_v46 = vadd.f32 %v1211_v41, %v1159_v45  ;;  %v1254_v47 = vadd.f32 %v5108_v43, %v1246_v42 }
 0x716   :  { %v1232_v48 = vadd.f32 %v3537_v44, %v1224_v46  ;;  %v1266_v57 = vsel %vm468_vm8, %v1254_v47, -inf  ;;  %v1247_v59 = vmax.f32 %v1231_v40, %v1239_v6 }
 0x717   :  { %1267 = vmax.xlane.f32.xlu1 %v1266_v57  ;;  %v1163_v0 = vpop.permute.xlu1 %1162 }
 0x718   :  { %v1240_v1 = vmul.f32 0.2, %v1232_v48  ;;  %v1225_v2 = vadd.f32 %v1211_v41, %v1163_v0  ;;  %v1255_v3 = vadd.f32 %v5118_v60, %v1247_v59 }
 0x71a   :  { %v1233_v7 = vadd.f32 %v3538_v62, %v1225_v2  ;;  %v1269_v12 = vsel %vm468_vm8, %v1255_v3, -inf  ;;  %v1248_v14 = vmax.f32 %v1232_v48, %v1240_v1 }
 0x71b   :  { %1270 = vmax.xlane.f32.xlu1 %v1269_v12  ;;  %v1170_v18 = vpop.permute.xlu1 %1169 }
 0x71c   :  { %v1241_v19 = vmul.f32 0.2, %v1233_v7  ;;  %v1226_v20 = vadd.f32 %v1215_v13, %v1170_v18  ;;  %v1256_v21 = vadd.f32 %v5108_v43, %v1248_v14 }
 0x71e   :  { %v1234_v23 = vadd.f32 %v3539_v16, %v1226_v20  ;;  %v1272_v58 = vsel %vm468_vm8, %v1256_v21, -inf  ;;  %v1249_v27 = vmax.f32 %v1233_v7, %v1241_v19 }
 0x71f   :  { %1273 = vmax.xlane.f32.xlu1 %v1272_v58  ;;  %v1174_v63 = vpop.permute.xlu1 %1173 }
 0x720   :  { %v1242_v25 = vmul.f32 0.2, %v1234_v23  ;;  %v1227_v28 = vadd.f32 %v1215_v13, %v1174_v63  ;;  %v1257_v29 = vadd.f32 %v5118_v60, %v1249_v27 }
 0x722   :  { %v1235_v24 = vadd.f32 %v3540_v8, %v1227_v28  ;;  %v1275_v30 = vsel %vm468_vm8, %v1257_v29, -inf  ;;  %v1250_v32 = vmax.f32 %v1234_v23, %v1242_v25  ;;  %v3591_v28 = vld [vmem:[%s5814_s2 + $0x100] sm:$0xff] }
 0x723   :  { %1276 = vmax.xlane.f32.xlu1 %v1275_v30 }
 0x724   :  { %v1243_v33 = vmul.f32 0.2, %v1235_v24  ;;  %v1258_v34 = vadd.f32 %v5108_v43, %v1250_v32  ;;  %v3594_v32 = vld [vmem:[%s5814_s2 + $0x118] sm:$0xff] }
 0x726   :  { %v1278_v35 = vsel %vm468_vm8, %v1258_v34, -inf  ;;  %v1251_v36 = vmax.f32 %v1235_v24, %v1243_v33  ;;  %v3593_v24 = vld [vmem:[%s5814_s2 + $0x110] sm:$0xff] }
 0x727   :  { %1279 = vmax.xlane.f32.xlu0 %v1278_v35  ;;  %v4544_v33 = vpack.c.bf16 %v3594_v32, %v3593_v24  ;;  %v3596_v35 = vld [vmem:[%s5814_s2 + $0x128] sm:$0xff] }
 0x728   :  { %v1259_v4 = vadd.f32 %v5118_v60, %v1251_v36 }
 0x72a   :  { %v1281_v37 = vsel %vm468_vm8, %v1259_v4, -inf }
 0x72b   :  { %1282 = vmax.xlane.f32.xlu1 %v1281_v37  ;;  %v3598_v37 = vld [vmem:[%s5814_s2 + $0x138] sm:$0xff] }
 0x79c   :  { %v1262_v38 = vpop.xlane.xlu1 %1261 }
 0x79d   :  { %v1284_v40 = vsub.f32 %v5301_v31, %v1262_v38 }
 0x79f   :  { %v1292_v5 = vmul.f32 1.442695, %v1284_v40  ;;  %v3599_v40 = vld [vmem:[%s5814_s2 + $0x140] sm:$0xff] }
 0x7a0   :  { %v1265_v41 = vpop.xlane.xlu0 %1264 }
 0x7a1   :  { %4778 = vpow2.f32 %v1292_v5  ;;  %v1285_v42 = vsub.f32 %v1253_v39, %v1265_v41  ;;  %v3600_v5 = vld [vmem:[%s5814_s2 + $0x148] sm:$0xff] }
 0x7a2   :  { %v4556_v41 = vpack.c.bf16 %v3600_v5, %v3599_v40 }
 0x7a3   :  { %v1294_v44 = vmul.f32 1.442695, %v1285_v42  ;;  %v3601_v42 = vld [vmem:[%s5814_s2 + $0x150] sm:$0xff] }
 0x7a4   :  { %v1268_v45 = vpop.xlane.xlu1 %1267 }
 0x7a5   :  { %4780 = vpow2.f32 %v1294_v44  ;;  %v1286_v43 = vsub.f32 %v1254_v47, %v1268_v45  ;;  %v3602_v44 = vld [vmem:[%s5814_s2 + $0x158] sm:$0xff] }
 0x7a6   :  { %v4560_v45 = vpack.c.bf16 %v3602_v44, %v3601_v42 }
 0x7a7   :  { %v1296_v6 = vmul.f32 1.442695, %v1286_v43  ;;  %v3603_v43 = vld [vmem:[%s5814_s2 + $0x160] sm:$0xff] }
 0x7a8   :  { %v1271_v46 = vpop.xlane.xlu1 %1270 }
 0x7a9   :  { %4782 = vpow2.f32 %v1296_v6  ;;  %v1287_v48 = vsub.f32 %v1255_v3, %v1271_v46  ;;  %v3604_v6 = vld [vmem:[%s5814_s2 + $0x168] sm:$0xff] }
 0x7aa   :  { %v4564_v46 = vpack.c.bf16 %v3604_v6, %v3603_v43 }
 0x7ab   :  { %v4779_v57 = vpop.eup %4778  ;;  %v1298_v60 = vmul.f32 1.442695, %v1287_v48  ;;  %v3605_v48 = vld [vmem:[%s5814_s2 + $0x170] sm:$0xff] }
 0x7ac   :  { %4107 = vmatprep.mubr.msk.f32.mxu0 %vm468_vm8, %v4779_v57  ;;  %v1274_v59 = vpop.xlane.xlu1 %1273  ;;  %v1308_v61 = vsel %vm468_vm8, %v4779_v57, 0.0  ;;  %v3606_v57 = vld [vmem:[%s5814_s2 + $0x178] sm:$0xff] }
 0x7ad   :  { %4784 = vpow2.f32 %v1298_v60  ;;  %v1288_v31 = vsub.f32 %v1256_v21, %v1274_v59  ;;  %1309 = vadd.xlane.f32.xlu0 %v1308_v61  ;;  %v4568_v60 = vpack.c.bf16 %v3606_v57, %v3605_v48  ;;  %v3607_v59 = vld [vmem:[%s5816_s3 + $0x100] sm:$0xff]  ;;  %v3608_v61 = vld [vmem:[%s5816_s3 + $0x108] sm:$0xff] }
 0x7af   :  { %v4781_v62 = vpop.eup %4780  ;;  %v1300_v39 = vmul.f32 1.442695, %v1288_v31  ;;  %v3609_v31 = vld [vmem:[%s5816_s3 + $0x110] sm:$0xff] }
 0x7b0   :  { %4108 = vmatmul.mubr.msk.f32.vlgmr.msra.gmra.mrb[4].mxu0 %vm468_vm8, %v4781_v62  ;;  %v1277_v0 = vpop.xlane.xlu1 %1276  ;;  %v1311_v47 = vsel %vm468_vm8, %v4781_v62, 0.0  ;;  %v4572_v62 = vpack.c.bf16 %v3608_v61, %v3607_v59 }
 0x7b1   :  { %4786 = vpow2.f32 %v1300_v39  ;;  %4535 = vmatpush3.bf16.msra.mxu0 %v5276_v49  ;;  %v1289_v1 = vsub.f32 %v1257_v29, %v1277_v0  ;;  %1312 = vadd.xlane.f32.xlu0 %v1311_v47  ;;  %v3592_v29 = vld [vmem:[%s5814_s2 + $0x108] sm:$0xff]  ;;  %v3610_v39 = vld [vmem:[%s5816_s3 + $0x118] sm:$0xff]  ;;  %v3611_v47 = vld [vmem:[%s5816_s3 + $0x120] sm:$0xff] }
 0x7b2   :  { %v4540_v30 = vpack.c.bf16 %v3592_v29, %v3591_v28  ;;  %v4576_v0 = vpack.c.bf16 %v3610_v39, %v3609_v31 }
 0x7b3   :  { %v4783_v2 = vpop.eup %4782  ;;  %v1302_v3 = vmul.f32 1.442695, %v1289_v1  ;;  %v3612_v1 = vld [vmem:[%s5816_s3 + $0x128] sm:$0xff] }
 0x7b4   :  { %v1280_v7 = vpop.xlane.xlu0 %1279  ;;  %4114 = vmatprep.mubr.msk.f32.mxu1 %vm468_vm8, %v4783_v2  ;;  %v1314_v12 = vsel %vm468_vm8, %v4783_v2, 0.0  ;;  %4541 = vmatprep.subr.bf16.mxu0 %v4540_v30  ;;  %v4580_v2 = vpack.c.bf16 %v3612_v1, %v3611_v47 }
 0x7b5   :  { %4788 = vpow2.f32 %v1302_v3  ;;  %v1290_v13 = vsub.f32 %v1258_v34, %v1280_v7  ;;  %1315 = vadd.xlane.f32.xlu1 %v1314_v12  ;;  %v3595_v34 = vld [vmem:[%s5814_s2 + $0x120] sm:$0xff]  ;;  %v3613_v3 = vld [vmem:[%s5816_s3 + $0x130] sm:$0xff]  ;;  %v3614_v7 = vld [vmem:[%s5816_s3 + $0x138] sm:$0xff] }
 0x7b6   :  { %v4548_v36 = vpack.c.bf16 %v3596_v35, %v3595_v34  ;;  %v4584_v12 = vpack.c.bf16 %v3614_v7, %v3613_v3 }
 0x7b7   :  { %v4785_v14 = vpop.eup %4784  ;;  %v1304_v16 = vmul.f32 1.442695, %v1290_v13  ;;  %v3615_v13 = vld [vmem:[%s5816_s3 + $0x140] sm:$0xff] }
 0x7b8   :  { %4115 = vmatmul.mubr.msk.f32.vlgmr.msra.gmra.mrb[12].mxu1 %vm468_vm8, %v4785_v14  ;;  %v1283_v18 = vpop.xlane.xlu1 %1282  ;;  %v1317_v19 = vsel %vm468_vm8, %v4785_v14, 0.0  ;;  %v3616_v14 = vld [vmem:[%s5816_s3 + $0x148] sm:$0xff] }
 0x7b9   :  { %4790 = vpow2.f32 %v1304_v16  ;;  %4539 = vmatpush3.bf16.msra.mxu1 %v5278_v50  ;;  %v1291_v49 = vsub.f32 %v1259_v4, %v1283_v18  ;;  %1318 = vadd.xlane.f32.xlu1 %v1317_v19  ;;  %v3597_v4 = vld [vmem:[%s5814_s2 + $0x130] sm:$0xff]  ;;  %v4588_v16 = vpack.c.bf16 %v3616_v14, %v3615_v13  ;;  %v3618_v19 = vld [vmem:[%s5816_s3 + $0x158] sm:$0xff] }
 0x7ba   :  { %v4552_v38 = vpack.c.bf16 %v3598_v37, %v3597_v4  ;;  %4573 = vmatprep.subr.bf16.mxu1 %v4572_v62  ;;  %v3617_v18 = vld [vmem:[%s5816_s3 + $0x150] sm:$0xff] }
 0x7bb   :  { %v4787_v20 = vpop.eup %4786  ;;  %v1306_v21 = vmul.f32 1.442695, %v1291_v49  ;;  %v4592_v49 = vpack.c.bf16 %v3618_v19, %v3617_v18 }
 0x7bc   :  { %4121 = vmatprep.mubr.msk.f32.mxu0 %vm468_vm8, %v4787_v20  ;;  %v1320_v23 = vsel %vm468_vm8, %v4787_v20, 0.0  ;;  %v3619_v20 = vld [vmem:[%s5816_s3 + $0x160] sm:$0xff] }
 0x7bd   :  { %4792 = vpow2.f32 %v1306_v21  ;;  %1321 = vadd.xlane.f32.xlu0 %v1320_v23  ;;  %v3620_v21 = vld [vmem:[%s5816_s3 + $0x168] sm:$0xff] }
 0x7be   :  { %v4596_v23 = vpack.c.bf16 %v3620_v21, %v3619_v20 }
 0x7bf   :  { %v4789_v58 = vpop.eup %4788 }
 0x7c0   :  { %4122 = vmatmul.mubr.msk.f32.vlgmr.msra.gmra.mrb[6].mxu0 %vm468_vm8, %v4789_v58  ;;  %v1323_v27 = vsel %vm468_vm8, %v4789_v58, 0.0  ;;  %v3621_v58 = vld [vmem:[%s5816_s3 + $0x170] sm:$0xff] }
 0x7c1   :  { %1324 = vadd.xlane.f32.xlu1 %v1323_v27  ;;  %4543 = vmatpush3.bf16.msra.mxu0 %v4540_v30  ;;  %v3622_v27 = vld [vmem:[%s5816_s3 + $0x178] sm:$0xff] }
 0x7c2   :  { %4545 = vmatprep.subr.bf16.mxu0 %v4544_v33 }
 0x7c3   :  { %v4791_v8 = vpop.eup %4790 }
 0x7c4   :  { %4128 = vmatprep.mubr.msk.f32.mxu1 %vm468_vm8, %v4791_v8  ;;  %v1326_v50 = vsel %vm468_vm8, %v4791_v8, 0.0  ;;  %v4600_v8 = vpack.c.bf16 %v3622_v27, %v3621_v58 }
 0x7c5   :  { %1327 = vadd.xlane.f32.xlu0 %v1326_v50  ;;  %4547 = vmatpush3.bf16.msra.mxu0 %v4544_v33 }
 0x7c6   :  { %4549 = vmatprep.subr.bf16.mxu0 %v4548_v36 }
 0x7c7   :  { %v4793_v63 = vpop.eup %4792 }
 0x7c8   :  { %4129 = vmatmul.mubr.msk.f32.vlgmr.msra.gmra.mrb[14].mxu1 %vm468_vm8, %v4793_v63  ;;  %v1329_v25 = vsel %vm468_vm8, %v4793_v63, 0.0 }
 0x7c9   :  { %1330 = vadd.xlane.f32.xlu1 %v1329_v25  ;;  %4551 = vmatpush3.bf16.msra.mxu0 %v4548_v36 }
 0x7ca   :  { %4553 = vmatprep.subr.bf16.mxu0 %v4552_v38  ;;  %4575 = vmatpush3.bf16.msra.mxu1 %v4572_v62 }
 0x7cb   :  { %4577 = vmatprep.subr.bf16.mxu1 %v4576_v0 }
 0x7cd   :  { %4555 = vmatpush3.bf16.msra.mxu0 %v4552_v38 }
 0x7ce   :  { %4557 = vmatprep.subr.bf16.mxu0 %v4556_v41  ;;  %4579 = vmatpush3.bf16.msra.mxu1 %v4576_v0 }
 0x7cf   :  { %4581 = vmatprep.subr.bf16.mxu1 %v4580_v2 }
 0x7d1   :  { %4559 = vmatpush3.bf16.msra.mxu0 %v4556_v41 }
 0x7d2   :  { %4561 = vmatprep.subr.bf16.mxu0 %v4560_v45  ;;  %4583 = vmatpush3.bf16.msra.mxu1 %v4580_v2  ;;  %v3582_v2 = vld [vmem:[%s5818_s4 + $0x1] ss:$0 sm:$0xff] }
 0x7d3   :  { %4585 = vmatprep.subr.bf16.mxu1 %v4584_v12 }
 0x7d5   :  { %4563 = vmatpush3.bf16.msra.mxu0 %v4560_v45 }
 0x7d6   :  { %4565 = vmatprep.subr.bf16.mxu0 %v4564_v46  ;;  %4587 = vmatpush3.bf16.msra.mxu1 %v4584_v12 }
 0x7d7   :  { %4589 = vmatprep.subr.bf16.mxu1 %v4588_v16 }
 0x7d9   :  { %4567 = vmatpush3.bf16.msra.mxu0 %v4564_v46 }
 0x7da   :  { %4569 = vmatprep.subr.bf16.mxu0 %v4568_v60  ;;  %4591 = vmatpush3.bf16.msra.mxu1 %v4588_v16 }
 0x7db   :  { %4593 = vmatprep.subr.bf16.mxu1 %v4592_v49 }
 0x7dd   :  { %4571 = vmatpush3.bf16.msra.mxu0 %v4568_v60 }
 0x7de   :  { %4595 = vmatpush3.bf16.msra.mxu1 %v4592_v49 }
 0x7df   :  { %4597 = vmatprep.subr.bf16.mxu1 %v4596_v23 }
 0x7e2   :  { %4599 = vmatpush3.bf16.msra.mxu1 %v4596_v23 }
 0x7e3   :  { %4601 = vmatprep.subr.bf16.mxu1 %v4600_v8 }
 0x7e6   :  { %4603 = vmatpush3.bf16.msra.mxu1 %v4600_v8 }
 0x83a   :  { %v1310_v50 = vpop.xlane.xlu0 %1309 }
 0x83b   :  { %4794 = vrcp.f32 %v1310_v50 }
 0x83e   :  { %v1313_v25 = vpop.xlane.xlu0 %1312 }
 0x83f   :  { %4796 = vrcp.f32 %v1313_v25 }
 0x842   :  { %v1316_v63 = vpop.xlane.xlu1 %1315 }
 0x845   :  { %v4795_v33 = vpop.eup %4794 }
 0x846   :  { %v1319_v28 = vpop.xlane.xlu1 %1318 }
 0x847   :  { %4798 = vrcp.f32 %v1319_v28 }
 0x848   :  { %4800 = vrcp.f32 %v1316_v63 }
 0x849   :  { %v4797_v34 = vpop.eup %4796 }
 0x84a   :  { %v1322_v32 = vpop.xlane.xlu0 %1321 }
 0x84e   :  { %v1325_v30 = vpop.xlane.xlu1 %1324 }
 0x84f   :  { %4802 = vrcp.f32 %v1325_v30 }
 0x850   :  { %4804 = vrcp.f32 %v1322_v32 }
 0x851   :  { %v4799_v35 = vpop.eup %4798 }
 0x852   :  { %v4801_v4 = vpop.eup %4800  ;;  %v1328_v45 = vpop.xlane.xlu0 %1327 }
 0x856   :  { %v1331_v42 = vpop.xlane.xlu1 %1330 }
 0x857   :  { %4806 = vrcp.f32 %v1331_v42 }
 0x858   :  { %4808 = vrcp.f32 %v1328_v45 }
 0x859   :  { %v4803_v6 = vpop.eup %4802 }
 0x85a   :  { %v4805_v48 = vpop.eup %4804 }
 0x861   :  { %v4807_v62 = vpop.eup %4806 }
 0x862   :  { %v4809_v0 = vpop.eup %4808 }
 0x883   :  { %v4109_v29 = vpop.f32.mrb[4].mxu0 }
 0x884   :  { %v1420_v24 = vpop.f32.mrb[5].mxu0  ;;  %v1673_v37 = vmul.f32 %v4797_v34, %v4109_v29 }
 0x885   :  { %v1672_v5 = vmul.f32 %v4795_v33, %v1420_v24 }
 0x88b   :  { %v4116_v36 = vpop.f32.mrb[12].mxu1 }
 0x88c   :  { %v1675_v38 = vmul.f32 %v4799_v35, %v4116_v36  ;;  %v1501_v40 = vpop.f32.mrb[13].mxu1 }
 0x88d   :  { %v1674_v41 = vmul.f32 %v4801_v4, %v1501_v40 }
 0x88e   :  { %v1683_v44 = vadd.f32 %v1675_v38, %v1673_v37 }
 0x88f   :  { %v1680_v43 = vadd.f32 %v1674_v41, %v1672_v5  ;;  %v3583_v41 = vld [vmem:[%s5817_s1 + $0x80] sm:$0xff] }
 0x893   :  { %v4123_v46 = vpop.f32.mrb[6].mxu0 }
 0x894   :  { %v1677_v57 = vmul.f32 %v4803_v6, %v4123_v46  ;;  %v1582_v60 = vpop.f32.mrb[7].mxu0  ;;  %v3584_v6 = vld [vmem:[%s5817_s1 + $0x88] sm:$0xff] }
 0x895   :  { %v1676_v59 = vmul.f32 %v4805_v48, %v1582_v60 }
 0x896   :  { %v1684_v61 = vadd.f32 %v1683_v44, %v1677_v57 }
 0x897   :  { %v1681_v31 = vadd.f32 %v1680_v43, %v1676_v59 }
 0x89b   :  { %v4130_v39 = vpop.f32.mrb[14].mxu1 }
 0x89c   :  { %v1679_v47 = vmul.f32 %v4807_v62, %v4130_v39  ;;  %v1663_v1 = vpop.f32.mrb[15].mxu1 }
 0x89d   :  { %v1678_v3 = vmul.f32 %v4809_v0, %v1663_v1 }
 0x89e   :  { %v1685_v7 = vadd.f32 %v1684_v61, %v1679_v47  ;;  %v5489_v47 = vld [vmem:[%s5817_s1 + $0x100] sm:$0xff] }
 0x89f   :  { %v1682_v12 = vadd.f32 %v1681_v31, %v1678_v3  ;;  %v3585_v31 = vld [vmem:[%s5817_s1 + $0x90] sm:$0xff] }
 0x8a0   :  { %v1695_v13 = vadd.f32 %v3582_v2, %v1685_v7 }
 0x8a1   :  { %v1694_v14 = vadd.f32 %v3582_v2, %v1682_v12 }
 0x8a2   :  { %v1697_v18 = vmax.f32 %v1695_v13, 0.0  ;;  %v3586_v13 = vld [vmem:[%s5817_s1 + $0x98] sm:$0xff] }
 0x8a3   :  { %v1696_v16 = vmax.f32 %v1694_v14, 0.0 }
 0x8a5   :  { %4163 = vmatprep.mubr.f32.mxu0 %v1696_v16 }
 0x8a6   :  { %4164 = vmatmul.mubr.f32.vlgmr.msra.gmra.mrb[8].mxu0 %v1697_v18 }
 0x979   :  { %v4165_v19 = vpop.f32.mrb[8].mxu0 }
 0x97a   :  { %v1790_v49 = vpop.f32.mrb[9].mxu0  ;;  %v2133_v20 = vmul.f32 %v4165_v19, %v5041_v53  ;;  %v2135_v21 = vmul.f32 %v4165_v19, %v5044_v54  ;;  %v2137_v23 = vmul.f32 %v4165_v19, %v5047_v55  ;;  %v2139_v58 = vmul.f32 %v4165_v19, %v5050_v56 }
 0x97b   :  { %4198 = vmatprep.mubr.f32.mxu1 %v1790_v49  ;;  %v2132_v27 = vmul.f32 %v1790_v49, %v5041_v53  ;;  %v2134_v8 = vmul.f32 %v1790_v49, %v5044_v54  ;;  %v2136_v50 = vmul.f32 %v1790_v49, %v5047_v55  ;;  %v2138_v63 = vmul.f32 %v1790_v49, %v5050_v56 }
 0x97c   :  { %4199 = vmatmul.mubr.f32.vlgmr.msra.gmra.mrb[16].mxu1 %v4165_v19  ;;  %v5502_v19 = vld [vmem:[%s5817_s1 + $0x108] sm:$0xff] }
 0x97d   :  { %v4604_v25 = vpack.c.bf16 %v2133_v20, %v2132_v27  ;;  %v4608_v28 = vpack.c.bf16 %v2135_v21, %v2134_v8  ;;  %v5462_v29 = vpack.c.bf16 %v2137_v23, %v2136_v50  ;;  %v5464_v24 = vpack.c.bf16 %v2139_v58, %v2138_v63  ;;  %v3587_v27 = vld [vmem:[%s5817_s1 + $0xa0] sm:$0xff] }
 0x97f   :  { %4605 = vmatprep.subr.bf16.mxu0 %v4604_v25  ;;  %4609 = vmatprep.subr.bf16.mxu1 %v4608_v28 }
 0x980   :  { %4607 = vmatpush3.bf16.msra.mxu0 %v4604_v25  ;;  %4611 = vmatpush3.bf16.msra.mxu1 %v4608_v28 }
 0x981   :  { %4613 = vmatprep.subr.bf16.mxu0 %v5462_v29  ;;  %4617 = vmatprep.subr.bf16.mxu1 %v5464_v24 }
 0xa4f   :  { %v4200_v30 = vpop.f32.mrb[16].mxu1 }
 0xa50   :  { %v1882_v32 = vpop.f32.mrb[17].mxu1 }
 0xa51   :  { %1891 = vxpose.xlu0.b32.start [1/2] (short) (narrow) %v1882_v32, 8 }
 0xa55   :  { %1892 = vxpose.xlu0.b32.end [2/2] (short) (narrow) %v4200_v30, 8 }
 0xad1   :  { %v1907_v33 = vpop.trf.xlu0 }
 0xad2   :  { %v1926_v34 = vrot.slane %v1907_v33, %v5073_v11  ;;  %v1937_v35 = vrot.slane %v1907_v33, %v5070_v10  ;;  %v1948_v36 = vrot.slane %v1907_v33, %v5078_v15  ;;  %v1959_v4 = vrot.slane %v1907_v33, %v5082_v17 }
 0xad3   :  { %v1974_v37 = vrot.slane %v1907_v33, %v5086_v22 }
 0xad4   :  { %1928 = vbcast.lane.b32.xlu1 %v1926_v34, 256 }
 0xad5   :  { %v1982_v38 = vrot.slane %v1974_v37, %v5086_v22  ;;  %v1975_v5 = vcombine.high %v1974_v37, %v1974_v37 }
 0xad7   :  { %v1995_v40 = vrot.slane %v1982_v38, %v5091_v26  ;;  %v1989_v43 = vrot.slane %v1975_v5, %v5086_v22  ;;  %v1990_v12 = vcombine.high %v1982_v38, %v1982_v38 }
 0xad8   :  { %1932 = vbcast.lane.b32.xlu1 %v1926_v34, 264  ;;  %v3588_v34 = vld [vmem:[%s5817_s1 + $0xa8] sm:$0xff] }
 0xad9   :  { %v1999_v59 = vrot.slane %v1989_v43, %v5091_v26  ;;  %v2003_v23 = vrot.slane %v1990_v12, %v5091_v26  ;;  %v1991_v33 = vcombine.high %v1989_v43, %v1989_v43 }
 0xadb   :  { %v2007_v5 = vrot.slane %v1991_v33, %v5091_v26 }
 0xadc   :  { %1939 = vbcast.lane.b32.xlu1 %v1937_v35, 256 }
 0xae0   :  { %1943 = vbcast.lane.b32.xlu1 %v1937_v35, 264 }
 0xae4   :  { %1950 = vbcast.lane.b32.xlu1 %v1948_v36, 256 }
 0xae8   :  { %1954 = vbcast.lane.b32.xlu1 %v1948_v36, 264 }
 0xaec   :  { %1961 = vbcast.lane.b32.xlu1 %v1959_v4, 256 }
 0xaf0   :  { %1965 = vbcast.lane.b32.xlu1 %v1959_v4, 264 }
 0xb46   :  { %v1929_v42 = vpop.permute.xlu1 %1928 }
 0xb47   :  { %v2012_v44 = vadd.f32 %v1995_v40, %v1929_v42  ;;  %v3589_v42 = vld [vmem:[%s5817_s1 + $0xb0] sm:$0xff] }
 0xb49   :  { %v2020_v45 = vadd.f32 %v3583_v41, %v2012_v44 }
 0xb4a   :  { %v1933_v46 = vpop.permute.xlu1 %1932 }
 0xb4b   :  { %v2028_v48 = vmul.f32 0.2, %v2020_v45  ;;  %v2013_v57 = vadd.f32 %v1995_v40, %v1933_v46 }
 0xb4d   :  { %v2021_v60 = vadd.f32 %v3584_v6, %v2013_v57  ;;  %v2036_v61 = vmax.f32 %v2020_v45, %v2028_v48 }
 0xb4e   :  { %v1940_v62 = vpop.permute.xlu1 %1939 }
 0xb4f   :  { %v2029_v39 = vmul.f32 0.2, %v2021_v60  ;;  %v2014_v0 = vadd.f32 %v1999_v59, %v1940_v62  ;;  %v5492_v1 = vadd.f32 %v5489_v47, %v2036_v61 }
 0xb51   :  { %v2022_v2 = vadd.f32 %v3585_v31, %v2014_v0  ;;  %v2052_v3 = vsel %vm468_vm8, %v5492_v1, -inf  ;;  %v2037_v7 = vmax.f32 %v2021_v60, %v2029_v39  ;;  %v3590_v60 = vld [vmem:[%s5817_s1 + $0xb8] sm:$0xff] }
 0xb52   :  { %2053 = vmax.xlane.f32.xlu1 %v2052_v3  ;;  %v1944_v14 = vpop.permute.xlu1 %1943 }
 0xb53   :  { %v2030_v16 = vmul.f32 0.2, %v2022_v2  ;;  %v2015_v18 = vadd.f32 %v1999_v59, %v1944_v14  ;;  %v2045_v49 = vadd.f32 %v5502_v19, %v2037_v7 }
 0xb55   :  { %v2023_v20 = vadd.f32 %v3586_v13, %v2015_v18  ;;  %v2055_v21 = vsel %vm468_vm8, %v2045_v49, -inf  ;;  %v2038_v58 = vmax.f32 %v2022_v2, %v2030_v16 }
 0xb56   :  { %2056 = vmax.xlane.f32.xlu0 %v2055_v21  ;;  %v1951_v8 = vpop.permute.xlu1 %1950 }
 0xb57   :  { %v2031_v50 = vmul.f32 0.2, %v2023_v20  ;;  %v2016_v63 = vadd.f32 %v2003_v23, %v1951_v8  ;;  %v2046_v25 = vadd.f32 %v5489_v47, %v2038_v58 }
 0xb59   :  { %v2024_v28 = vadd.f32 %v3587_v27, %v2016_v63  ;;  %v2058_v30 = vsel %vm468_vm8, %v2046_v25, -inf  ;;  %v2039_v32 = vmax.f32 %v2023_v20, %v2031_v50 }
 0xb5a   :  { %2059 = vmax.xlane.f32.xlu1 %v2058_v30  ;;  %v1955_v35 = vpop.permute.xlu1 %1954 }
 0xb5b   :  { %v2032_v36 = vmul.f32 0.2, %v2024_v28  ;;  %v2017_v4 = vadd.f32 %v2003_v23, %v1955_v35  ;;  %v2047_v37 = vadd.f32 %v5502_v19, %v2039_v32 }
 0xb5d   :  { %v2025_v38 = vadd.f32 %v3588_v34, %v2017_v4  ;;  %v2061_v40 = vsel %vm468_vm8, %v2047_v37, -inf  ;;  %v2040_v41 = vmax.f32 %v2024_v28, %v2032_v36 }
 0xb5e   :  { %2062 = vmax.xlane.f32.xlu1 %v2061_v40  ;;  %v1962_v44 = vpop.permute.xlu1 %1961 }
 0xb5f   :  { %v2033_v45 = vmul.f32 0.2, %v2025_v38  ;;  %v2018_v43 = vadd.f32 %v2007_v5, %v1962_v44  ;;  %v2048_v6 = vadd.f32 %v5489_v47, %v2040_v41 }
 0xb61   :  { %v2026_v46 = vadd.f32 %v3589_v42, %v2018_v43  ;;  %v2064_v48 = vsel %vm468_vm8, %v2048_v6, -inf  ;;  %v2041_v57 = vmax.f32 %v2025_v38, %v2033_v45 }
 0xb62   :  { %2065 = vmax.xlane.f32.xlu1 %v2064_v48  ;;  %v1966_v59 = vpop.permute.xlu1 %1965 }
 0xb63   :  { %v2034_v61 = vmul.f32 0.2, %v2026_v46  ;;  %v2019_v31 = vadd.f32 %v2007_v5, %v1966_v59  ;;  %v2049_v62 = vadd.f32 %v5502_v19, %v2041_v57 }
 0xb65   :  { %v2027_v39 = vadd.f32 %v3590_v60, %v2019_v31  ;;  %v2067_v0 = vsel %vm468_vm8, %v2049_v62, -inf  ;;  %v2042_v2 = vmax.f32 %v2026_v46, %v2034_v61 }
 0xb66   :  { %2068 = vmax.xlane.f32.xlu0 %v2067_v0  ;;  %v3642_v0 = vld [vmem:[%s5814_s2 + $0x188] sm:$0xff] }
 0xb67   :  { %v2035_v3 = vmul.f32 0.2, %v2027_v39  ;;  %v2050_v7 = vadd.f32 %v5489_v47, %v2042_v2  ;;  %v3643_v2 = vld [vmem:[%s5814_s2 + $0x190] sm:$0xff] }
 0xb69   :  { %v2070_v12 = vsel %vm468_vm8, %v2050_v7, -inf  ;;  %v2043_v13 = vmax.f32 %v2027_v39, %v2035_v3  ;;  %v3641_v39 = vld [vmem:[%s5814_s2 + $0x180] sm:$0xff] }
 0xb6a   :  { %2071 = vmax.xlane.f32.xlu1 %v2070_v12  ;;  %v4620_v3 = vpack.c.bf16 %v3642_v0, %v3641_v39 }
 0xb6b   :  { %v2051_v14 = vadd.f32 %v5502_v19, %v2043_v13  ;;  %v3645_v13 = vld [vmem:[%s5814_s2 + $0x1a0] sm:$0xff] }
 0xb6d   :  { %v2073_v16 = vsel %vm468_vm8, %v2051_v14, -inf }
 0xb6e   :  { %2074 = vmax.xlane.f32.xlu0 %v2073_v16 }
 0xbdf   :  { %v2054_v18 = vpop.xlane.xlu1 %2053 }
 0xbe0   :  { %v2076_v20 = vsub.f32 %v5492_v1, %v2054_v18  ;;  %v3647_v18 = vld [vmem:[%s5814_s2 + $0x1b0] sm:$0xff] }
 0xbe2   :  { %v2084_v21 = vmul.f32 1.442695, %v2076_v20  ;;  %v3648_v20 = vld [vmem:[%s5814_s2 + $0x1b8] sm:$0xff] }
 0xbe3   :  { %v2057_v23 = vpop.xlane.xlu0 %2056 }
 0xbe4   :  { %4810 = vpow2.f32 %v2084_v21  ;;  %v2077_v58 = vsub.f32 %v2045_v49, %v2057_v23  ;;  %v4632_v21 = vpack.c.bf16 %v3648_v20, %v3647_v18  ;;  %v3649_v23 = vld [vmem:[%s5814_s2 + $0x1c0] sm:$0xff] }
 0xbe6   :  { %v2086_v27 = vmul.f32 1.442695, %v2077_v58  ;;  %v3650_v58 = vld [vmem:[%s5814_s2 + $0x1c8] sm:$0xff] }
 0xbe7   :  { %v2060_v8 = vpop.xlane.xlu1 %2059 }
 0xbe8   :  { %4812 = vpow2.f32 %v2086_v27  ;;  %v2078_v50 = vsub.f32 %v2046_v25, %v2060_v8  ;;  %v4636_v27 = vpack.c.bf16 %v3650_v58, %v3649_v23  ;;  %v3651_v8 = vld [vmem:[%s5814_s2 + $0x1d0] sm:$0xff] }
 0xbea   :  { %v2088_v63 = vmul.f32 1.442695, %v2078_v50  ;;  %v3652_v50 = vld [vmem:[%s5814_s2 + $0x1d8] sm:$0xff] }
 0xbeb   :  { %v2063_v28 = vpop.xlane.xlu1 %2062 }
 0xbec   :  { %4814 = vpow2.f32 %v2088_v63  ;;  %v2079_v30 = vsub.f32 %v2047_v37, %v2063_v28  ;;  %v4640_v63 = vpack.c.bf16 %v3652_v50, %v3651_v8  ;;  %v3653_v28 = vld [vmem:[%s5814_s2 + $0x1e0] sm:$0xff] }
 0xbee   :  { %v4811_v32 = vpop.eup %4810  ;;  %v2090_v33 = vmul.f32 1.442695, %v2079_v30  ;;  %v3654_v30 = vld [vmem:[%s5814_s2 + $0x1e8] sm:$0xff] }
 0xbef   :  { %4205 = vmatprep.mubr.msk.f32.mxu0 %vm468_vm8, %v4811_v32  ;;  %v2066_v34 = vpop.xlane.xlu1 %2065  ;;  %v2100_v35 = vsel %vm468_vm8, %v4811_v32, 0.0  ;;  %v4644_v32 = vpack.c.bf16 %v3654_v30, %v3653_v28 }
 0xbf0   :  { %4816 = vpow2.f32 %v2090_v33  ;;  %v2080_v1 = vsub.f32 %v2048_v6, %v2066_v34  ;;  %2101 = vadd.xlane.f32.xlu1 %v2100_v35  ;;  %v3655_v33 = vld [vmem:[%s5814_s2 + $0x1f0] sm:$0xff]  ;;  %v3656_v34 = vld [vmem:[%s5814_s2 + $0x1f8] sm:$0xff] }
 0xbf1   :  { %v4648_v35 = vpack.c.bf16 %v3656_v34, %v3655_v33 }
 0xbf2   :  { %v4813_v36 = vpop.eup %4812  ;;  %v2092_v49 = vmul.f32 1.442695, %v2080_v1  ;;  %v3657_v1 = vld [vmem:[%s5816_s3 + $0x180] sm:$0xff] }
 0xbf3   :  { %v2069_v4 = vpop.xlane.xlu0 %2068  ;;  %4206 = vmatmul.mubr.msk.f32.vlgmr.msra.gmra.mrb[10].mxu0 %vm468_vm8, %v4813_v36  ;;  %v2103_v25 = vsel %vm468_vm8, %v4813_v36, 0.0  ;;  %v3658_v36 = vld [vmem:[%s5816_s3 + $0x188] sm:$0xff] }
 0xbf4   :  { %4818 = vpow2.f32 %v2092_v49  ;;  %v2081_v38 = vsub.f32 %v2049_v62, %v2069_v4  ;;  %4615 = vmatpush3.bf16.msra.mxu0 %v5462_v29  ;;  %2104 = vadd.xlane.f32.xlu1 %v2103_v25  ;;  %v3659_v49 = vld [vmem:[%s5816_s3 + $0x190] sm:$0xff]  ;;  %v4652_v4 = vpack.c.bf16 %v3658_v36, %v3657_v1  ;;  %v3660_v25 = vld [vmem:[%s5816_s3 + $0x198] sm:$0xff] }
 0xbf5   :  { %4621 = vmatprep.subr.bf16.mxu0 %v4620_v3 }
 0xbf6   :  { %v4815_v37 = vpop.eup %4814  ;;  %v2094_v40 = vmul.f32 1.442695, %v2081_v38  ;;  %v4656_v38 = vpack.c.bf16 %v3660_v25, %v3659_v49 }
 0xbf7   :  { %4212 = vmatprep.mubr.msk.f32.mxu1 %vm468_vm8, %v4815_v37  ;;  %v2072_v5 = vpop.xlane.xlu1 %2071  ;;  %v2106_v41 = vsel %vm468_vm8, %v4815_v37, 0.0  ;;  %v3661_v37 = vld [vmem:[%s5816_s3 + $0x1a0] sm:$0xff] }
 0xbf8   :  { %4820 = vpow2.f32 %v2094_v40  ;;  %v2082_v42 = vsub.f32 %v2050_v7, %v2072_v5  ;;  %2107 = vadd.xlane.f32.xlu0 %v2106_v41  ;;  %v3644_v7 = vld [vmem:[%s5814_s2 + $0x198] sm:$0xff]  ;;  %v3662_v40 = vld [vmem:[%s5816_s3 + $0x1a8] sm:$0xff]  ;;  %v3663_v41 = vld [vmem:[%s5816_s3 + $0x1b0] sm:$0xff] }
 0xbf9   :  { %v4624_v12 = vpack.c.bf16 %v3644_v7, %v3643_v2  ;;  %v4660_v5 = vpack.c.bf16 %v3662_v40, %v3661_v37 }
 0xbfa   :  { %v4817_v44 = vpop.eup %4816  ;;  %v2096_v45 = vmul.f32 1.442695, %v2082_v42  ;;  %v3664_v42 = vld [vmem:[%s5816_s3 + $0x1b8] sm:$0xff] }
 0xbfb   :  { %v2075_v43 = vpop.xlane.xlu0 %2074  ;;  %4213 = vmatmul.mubr.msk.f32.vlgmr.msra.gmra.mrb[18].mxu1 %vm468_vm8, %v4817_v44  ;;  %v2109_v6 = vsel %vm468_vm8, %v4817_v44, 0.0  ;;  %v4664_v44 = vpack.c.bf16 %v3664_v42, %v3663_v41  ;;  %v3632_v42 = vld [vmem:[%s5818_s4 + $0x2] ss:$0 sm:$0xff] }
 0xbfc   :  { %4822 = vpow2.f32 %v2096_v45  ;;  %v2083_v29 = vsub.f32 %v2051_v14, %v2075_v43  ;;  %4619 = vmatpush3.bf16.msra.mxu1 %v5464_v24  ;;  %2110 = vadd.xlane.f32.xlu0 %v2109_v6  ;;  %v3646_v14 = vld [vmem:[%s5814_s2 + $0x1a8] sm:$0xff]  ;;  %v3665_v45 = vld [vmem:[%s5816_s3 + $0x1c0] sm:$0xff] }
 0xbfd   :  { %v4628_v16 = vpack.c.bf16 %v3646_v14, %v3645_v13  ;;  %4653 = vmatprep.subr.bf16.mxu1 %v4652_v4  ;;  %v3666_v43 = vld [vmem:[%s5816_s3 + $0x1c8] sm:$0xff] }
 0xbfe   :  { %v4819_v46 = vpop.eup %4818  ;;  %v2098_v48 = vmul.f32 1.442695, %v2083_v29  ;;  %v4668_v6 = vpack.c.bf16 %v3666_v43, %v3665_v45  ;;  %v3667_v29 = vld [vmem:[%s5816_s3 + $0x1d0] sm:$0xff] }
 0xbff   :  { %4219 = vmatprep.mubr.msk.f32.mxu0 %vm468_vm8, %v4819_v46  ;;  %v2112_v57 = vsel %vm468_vm8, %v4819_v46, 0.0  ;;  %v3668_v46 = vld [vmem:[%s5816_s3 + $0x1d8] sm:$0xff] }
 0xc00   :  { %4824 = vpow2.f32 %v2098_v48  ;;  %2113 = vadd.xlane.f32.xlu1 %v2112_v57  ;;  %v4672_v48 = vpack.c.bf16 %v3668_v46, %v3667_v29  ;;  %v3669_v57 = vld [vmem:[%s5816_s3 + $0x1e0] sm:$0xff] }
 0xc02   :  { %v4821_v60 = vpop.eup %4820 }
 0xc03   :  { %4220 = vmatmul.mubr.msk.f32.vlgmr.msra.gmra.mrb[12].mxu0 %vm468_vm8, %v4821_v60  ;;  %v2115_v59 = vsel %vm468_vm8, %v4821_v60, 0.0  ;;  %v3670_v60 = vld [vmem:[%s5816_s3 + $0x1e8] sm:$0xff] }
 0xc04   :  { %2116 = vadd.xlane.f32.xlu0 %v2115_v59  ;;  %4623 = vmatpush3.bf16.msra.mxu0 %v4620_v3  ;;  %v4676_v59 = vpack.c.bf16 %v3670_v60, %v3669_v57 }
 0xc05   :  { %4625 = vmatprep.subr.bf16.mxu0 %v4624_v12 }
 0xc06   :  { %v4823_v61 = vpop.eup %4822 }
 0xc07   :  { %4226 = vmatprep.mubr.msk.f32.mxu1 %vm468_vm8, %v4823_v61  ;;  %v2118_v24 = vsel %vm468_vm8, %v4823_v61, 0.0  ;;  %v3671_v61 = vld [vmem:[%s5816_s3 + $0x1f0] sm:$0xff] }
 0xc08   :  { %2119 = vadd.xlane.f32.xlu1 %v2118_v24  ;;  %4627 = vmatpush3.bf16.msra.mxu0 %v4624_v12  ;;  %v3672_v24 = vld [vmem:[%s5816_s3 + $0x1f8] sm:$0xff] }
 0xc09   :  { %4629 = vmatprep.subr.bf16.mxu0 %v4628_v16 }
 0xc0a   :  { %v4825_v31 = vpop.eup %4824 }
 0xc0b   :  { %4227 = vmatmul.mubr.msk.f32.vlgmr.msra.gmra.mrb[20].mxu1 %vm468_vm8, %v4825_v31  ;;  %v2121_v62 = vsel %vm468_vm8, %v4825_v31, 0.0  ;;  %v4680_v31 = vpack.c.bf16 %v3672_v24, %v3671_v61 }
 0xc0c   :  { %2122 = vadd.xlane.f32.xlu0 %v2121_v62  ;;  %4631 = vmatpush3.bf16.msra.mxu0 %v4628_v16 }
 0xc0d   :  { %4633 = vmatprep.subr.bf16.mxu0 %v4632_v21  ;;  %4655 = vmatpush3.bf16.msra.mxu1 %v4652_v4 }
 0xc0e   :  { %4657 = vmatprep.subr.bf16.mxu1 %v4656_v38 }
 0xc10   :  { %4635 = vmatpush3.bf16.msra.mxu0 %v4632_v21 }
 0xc11   :  { %4637 = vmatprep.subr.bf16.mxu0 %v4636_v27  ;;  %4659 = vmatpush3.bf16.msra.mxu1 %v4656_v38 }
 0xc12   :  { %4661 = vmatprep.subr.bf16.mxu1 %v4660_v5 }
 0xc14   :  { %4639 = vmatpush3.bf16.msra.mxu0 %v4636_v27 }
 0xc15   :  { %4641 = vmatprep.subr.bf16.mxu0 %v4640_v63  ;;  %4663 = vmatpush3.bf16.msra.mxu1 %v4660_v5 }
 0xc16   :  { %4665 = vmatprep.subr.bf16.mxu1 %v4664_v44 }
 0xc18   :  { %4643 = vmatpush3.bf16.msra.mxu0 %v4640_v63 }
 0xc19   :  { %4645 = vmatprep.subr.bf16.mxu0 %v4644_v32  ;;  %4667 = vmatpush3.bf16.msra.mxu1 %v4664_v44 }
 0xc1a   :  { %4669 = vmatprep.subr.bf16.mxu1 %v4668_v6 }
 0xc1c   :  { %4647 = vmatpush3.bf16.msra.mxu0 %v4644_v32 }
 0xc1d   :  { %4649 = vmatprep.subr.bf16.mxu0 %v4648_v35  ;;  %4671 = vmatpush3.bf16.msra.mxu1 %v4668_v6 }
 0xc1e   :  { %4673 = vmatprep.subr.bf16.mxu1 %v4672_v48 }
 0xc20   :  { %4651 = vmatpush3.bf16.msra.mxu0 %v4648_v35 }
 0xc21   :  { %4675 = vmatpush3.bf16.msra.mxu1 %v4672_v48 }
 0xc22   :  { %4677 = vmatprep.subr.bf16.mxu1 %v4676_v59 }
 0xc25   :  { %4679 = vmatpush3.bf16.msra.mxu1 %v4676_v59 }
 0xc26   :  { %4681 = vmatprep.subr.bf16.mxu1 %v4680_v31 }
 0xc29   :  { %4683 = vmatpush3.bf16.msra.mxu1 %v4680_v31 }
 0xc7d   :  { %v2102_v62 = vpop.xlane.xlu1 %2101 }
 0xc7e   :  { %4826 = vrcp.f32 %v2102_v62 }
 0xc81   :  { %v2105_v0 = vpop.xlane.xlu1 %2104 }
 0xc82   :  { %4828 = vrcp.f32 %v2105_v0 }
 0xc85   :  { %v2108_v39 = vpop.xlane.xlu0 %2107 }
 0xc88   :  { %v4827_v14 = vpop.eup %4826 }
 0xc89   :  { %v2111_v2 = vpop.xlane.xlu0 %2110 }
 0xc8a   :  { %4830 = vrcp.f32 %v2111_v2 }
 0xc8b   :  { %4832 = vrcp.f32 %v2108_v39 }
 0xc8c   :  { %v4829_v16 = vpop.eup %4828 }
 0xc8d   :  { %v2114_v13 = vpop.xlane.xlu1 %2113 }
 0xc91   :  { %v2117_v12 = vpop.xlane.xlu0 %2116 }
 0xc92   :  { %4834 = vrcp.f32 %v2117_v12 }
 0xc93   :  { %4836 = vrcp.f32 %v2114_v13 }
 0xc94   :  { %v4831_v18 = vpop.eup %4830 }
 0xc95   :  { %v4833_v21 = vpop.eup %4832  ;;  %v2120_v30 = vpop.xlane.xlu1 %2119 }
 0xc99   :  { %v2123_v63 = vpop.xlane.xlu0 %2122 }
 0xc9a   :  { %4838 = vrcp.f32 %v2123_v63 }
 0xc9b   :  { %4840 = vrcp.f32 %v2120_v30 }
 0xc9c   :  { %v4835_v33 = vpop.eup %4834 }
 0xc9d   :  { %v4837_v35 = vpop.eup %4836 }
 0xca4   :  { %v4839_v38 = vpop.eup %4838 }
 0xca5   :  { %v4841_v40 = vpop.eup %4840 }
 0xcc6   :  { %v4207_v3 = vpop.f32.mrb[10].mxu0 }
 0xcc7   :  { %v2212_v7 = vpop.f32.mrb[11].mxu0  ;;  %v2465_v23 = vmul.f32 %v4829_v16, %v4207_v3 }
 0xcc8   :  { %v2464_v8 = vmul.f32 %v4827_v14, %v2212_v7 }
 0xcce   :  { %v4214_v20 = vpop.f32.mrb[18].mxu1 }
 0xccf   :  { %v2467_v58 = vmul.f32 %v4831_v18, %v4214_v20  ;;  %v2293_v27 = vpop.f32.mrb[19].mxu1 }
 0xcd0   :  { %v2466_v50 = vmul.f32 %v4833_v21, %v2293_v27 }
 0xcd1   :  { %v2475_v28 = vadd.f32 %v2467_v58, %v2465_v23 }
 0xcd2   :  { %v2472_v32 = vadd.f32 %v2466_v50, %v2464_v8 }
 0xcd6   :  { %v4221_v34 = vpop.f32.mrb[12].mxu0 }
 0xcd7   :  { %v2469_v1 = vmul.f32 %v4835_v33, %v4221_v34  ;;  %v2374_v36 = vpop.f32.mrb[13].mxu0  ;;  %v3635_v34 = vld [vmem:[%s5817_s1 + $0xd0] sm:$0xff] }
 0xcd8   :  { %v2468_v49 = vmul.f32 %v4837_v35, %v2374_v36 }
 0xcd9   :  { %v2476_v4 = vadd.f32 %v2475_v28, %v2469_v1 }
 0xcda   :  { %v2473_v25 = vadd.f32 %v2472_v32, %v2468_v49 }
 0xcde   :  { %v4228_v37 = vpop.f32.mrb[20].mxu1 }
 0xcdf   :  { %v2471_v5 = vmul.f32 %v4839_v38, %v4228_v37  ;;  %v2455_v41 = vpop.f32.mrb[21].mxu1  ;;  %v3636_v37 = vld [vmem:[%s5817_s1 + $0xd8] sm:$0xff] }
 0xce0   :  { %v2470_v44 = vmul.f32 %v4841_v40, %v2455_v41 }
 0xce1   :  { %v2477_v45 = vadd.f32 %v2476_v4, %v2471_v5 }
 0xce2   :  { %v2474_v43 = vadd.f32 %v2473_v25, %v2470_v44 }
 0xce3   :  { %v2487_v6 = vadd.f32 %v3632_v42, %v2477_v45 }
 0xce4   :  { %v2486_v29 = vadd.f32 %v3632_v42, %v2474_v43 }
 0xce5   :  { %v2489_v48 = vmax.f32 %v2487_v6, 0.0 }
 0xce6   :  { %v2488_v46 = vmax.f32 %v2486_v29, 0.0  ;;  %v3637_v29 = vld [vmem:[%s5817_s1 + $0xe0] sm:$0xff] }
 0xce8   :  { %4261 = vmatprep.mubr.f32.mxu0 %v2488_v46 }
 0xce9   :  { %4262 = vmatmul.mubr.f32.vlgmr.msra.gmra.mrb[14].mxu0 %v2489_v48 }
 0xdbc   :  { %v4263_v57 = vpop.f32.mrb[14].mxu0 }
 0xdbd   :  { %v2582_v60 = vpop.f32.mrb[15].mxu0  ;;  %v2925_v59 = vmul.f32 %v4263_v57, %v5041_v53  ;;  %v2927_v61 = vmul.f32 %v4263_v57, %v5044_v54  ;;  %v2929_v24 = vmul.f32 %v4263_v57, %v5047_v55  ;;  %v2931_v31 = vmul.f32 %v4263_v57, %v5050_v56 }
 0xdbe   :  { %4296 = vmatprep.mubr.f32.mxu1 %v2582_v60  ;;  %v2924_v62 = vmul.f32 %v2582_v60, %v5041_v53  ;;  %v2926_v39 = vmul.f32 %v2582_v60, %v5044_v54  ;;  %v2928_v0 = vmul.f32 %v2582_v60, %v5047_v55  ;;  %v2930_v2 = vmul.f32 %v2582_v60, %v5050_v56 }
 0xdbf   :  { %4297 = vmatmul.mubr.f32.vlgmr.msra.gmra.mrb[22].mxu1 %v4263_v57 }
 0xdc0   :  { %v4684_v3 = vpack.c.bf16 %v2925_v59, %v2924_v62  ;;  %v4688_v7 = vpack.c.bf16 %v2927_v61, %v2926_v39  ;;  %v5658_v12 = vpack.c.bf16 %v2929_v24, %v2928_v0  ;;  %v5660_v13 = vpack.c.bf16 %v2931_v31, %v2930_v2  ;;  %v3638_v62 = vld [vmem:[%s5817_s1 + $0xe8] sm:$0xff] }
 0xdc2   :  { %4685 = vmatprep.subr.bf16.mxu0 %v4684_v3  ;;  %4689 = vmatprep.subr.bf16.mxu1 %v4688_v7 }
 0xdc3   :  { %4687 = vmatpush3.bf16.msra.mxu0 %v4684_v3  ;;  %4691 = vmatpush3.bf16.msra.mxu1 %v4688_v7 }
 0xdc4   :  { %4693 = vmatprep.subr.bf16.mxu0 %v5658_v12  ;;  %4697 = vmatprep.subr.bf16.mxu1 %v5660_v13 }
 0xe92   :  { %v4298_v53 = vpop.f32.mrb[22].mxu1 }
 0xe93   :  { %v2674_v54 = vpop.f32.mrb[23].mxu1 }
 0xe94   :  { %2683 = vxpose.xlu1.b32.start [1/2] (short) (narrow) %v2674_v54, 8 }
 0xe98   :  { %2684 = vxpose.xlu1.b32.end [2/2] (short) (narrow) %v4298_v53, 8 }
 0xf14   :  { %v2699_v55 = vpop.trf.xlu1 }
 0xf15   :  { %v2718_v56 = vrot.slane %v2699_v55, %v5073_v11  ;;  %v2729_v14 = vrot.slane %v2699_v55, %v5070_v10  ;;  %v2740_v16 = vrot.slane %v2699_v55, %v5078_v15  ;;  %v2751_v18 = vrot.slane %v2699_v55, %v5082_v17  ;;  %v3633_v10 = vld [vmem:[%s5817_s1 + $0xc0] sm:$0xff]  ;;  %v3634_v17 = vld [vmem:[%s5817_s1 + $0xc8] sm:$0xff] }
 0xf16   :  { %v2766_v20 = vrot.slane %v2699_v55, %v5086_v22 }
 0xf17   :  { %2720 = vbcast.lane.b32.xlu0 %v2718_v56, 256 }
 0xf18   :  { %v2774_v21 = vrot.slane %v2766_v20, %v5086_v22  ;;  %v2767_v23 = vcombine.high %v2766_v20, %v2766_v20 }
 0xf1a   :  { %v2787_v11 = vrot.slane %v2774_v21, %v5091_v26  ;;  %v2781_v8 = vrot.slane %v2767_v23, %v5086_v22  ;;  %v2782_v38 = vcombine.high %v2774_v21, %v2774_v21 }
 0xf1b   :  { %2724 = vbcast.lane.b32.xlu0 %v2718_v56, 264  ;;  %v3639_v56 = vld [vmem:[%s5817_s1 + $0xf0] sm:$0xff] }
 0xf1c   :  { %v2791_v32 = vrot.slane %v2781_v8, %v5091_v26  ;;  %v2795_v43 = vrot.slane %v2782_v38, %v5091_v26  ;;  %v2783_v31 = vcombine.high %v2781_v8, %v2781_v8 }
 0xf1e   :  { %v2799_v54 = vrot.slane %v2783_v31, %v5091_v26  ;;  %v3640_v26 = vld [vmem:[%s5817_s1 + $0xf8] sm:$0xff] }
 0xf1f   :  { %2731 = vbcast.lane.b32.xlu0 %v2729_v14, 256 }
 0xf23   :  { %2735 = vbcast.lane.b32.xlu0 %v2729_v14, 264 }
 0xf27   :  { %2742 = vbcast.lane.b32.xlu0 %v2740_v16, 256 }
 0xf2b   :  { %2746 = vbcast.lane.b32.xlu0 %v2740_v16, 264 }
 0xf2f   :  { %2753 = vbcast.lane.b32.xlu0 %v2751_v18, 256 }
 0xf33   :  { %2757 = vbcast.lane.b32.xlu0 %v2751_v18, 264 }
 0xf89   :  { %v2721_v58 = vpop.permute.xlu0 %2720 }
 0xf8a   :  { %v2804_v27 = vadd.f32 %v2787_v11, %v2721_v58 }
 0xf8c   :  { %v2812_v15 = vadd.f32 %v3633_v10, %v2804_v27 }
 0xf8d   :  { %v2725_v50 = vpop.permute.xlu0 %2724 }
 0xf8e   :  { %v2820_v63 = vmul.f32 0.2, %v2812_v15  ;;  %v2805_v28 = vadd.f32 %v2787_v11, %v2725_v50 }
 0xf90   :  { %v2813_v30 = vadd.f32 %v3634_v17, %v2805_v28  ;;  %v2828_v33 = vmax.f32 %v2812_v15, %v2820_v63 }
 0xf91   :  { %v2732_v35 = vpop.permute.xlu0 %2731 }
 0xf92   :  { %v2821_v1 = vmul.f32 0.2, %v2813_v30  ;;  %v2806_v36 = vadd.f32 %v2791_v32, %v2732_v35  ;;  %v5683_v22 = vadd.f32 %v5489_v47, %v2828_v33 }
 0xf94   :  { %v2829_v49 = vmax.f32 %v2813_v30, %v2821_v1  ;;  %v2814_v4 = vadd.f32 %v3635_v34, %v2806_v36  ;;  %v2844_v25 = vsel %vm468_vm8, %v5683_v22, -inf }
 0xf95   :  { %2845 = vmax.xlane.f32.xlu0 %v2844_v25  ;;  %v2736_v40 = vpop.permute.xlu0 %2735 }
 0xf96   :  { %v2822_v5 = vmul.f32 0.2, %v2814_v4  ;;  %v2807_v41 = vadd.f32 %v2791_v32, %v2736_v40  ;;  %v2837_v42 = vadd.f32 %v5502_v19, %v2829_v49 }
 0xf98   :  { %v2815_v44 = vadd.f32 %v3636_v37, %v2807_v41  ;;  %v2847_v45 = vsel %vm468_vm8, %v2837_v42, -inf  ;;  %v2830_v6 = vmax.f32 %v2814_v4, %v2822_v5 }
 0xf99   :  { %2848 = vmax.xlane.f32.xlu1 %v2847_v45  ;;  %v2743_v46 = vpop.permute.xlu0 %2742 }
 0xf9a   :  { %v2823_v48 = vmul.f32 0.2, %v2815_v44  ;;  %v2808_v57 = vadd.f32 %v2795_v43, %v2743_v46  ;;  %v2838_v60 = vadd.f32 %v5489_v47, %v2830_v6 }
 0xf9c   :  { %v2816_v59 = vadd.f32 %v3637_v29, %v2808_v57  ;;  %v2850_v61 = vsel %vm468_vm8, %v2838_v60, -inf  ;;  %v2831_v24 = vmax.f32 %v2815_v44, %v2823_v48 }
 0xf9d   :  { %2851 = vmax.xlane.f32.xlu0 %v2850_v61  ;;  %v2747_v39 = vpop.permute.xlu0 %2746 }
 0xf9e   :  { %v2824_v0 = vmul.f32 0.2, %v2816_v59  ;;  %v2809_v2 = vadd.f32 %v2795_v43, %v2747_v39  ;;  %v2839_v3 = vadd.f32 %v5502_v19, %v2831_v24 }
 0xfa0   :  { %v2817_v7 = vadd.f32 %v3638_v62, %v2809_v2  ;;  %v2853_v53 = vsel %vm468_vm8, %v2839_v3, -inf  ;;  %v2832_v55 = vmax.f32 %v2816_v59, %v2824_v0 }
 0xfa1   :  { %2854 = vmax.xlane.f32.xlu0 %v2853_v53  ;;  %v2754_v14 = vpop.permute.xlu0 %2753 }
 0xfa2   :  { %v2825_v16 = vmul.f32 0.2, %v2817_v7  ;;  %v2810_v18 = vadd.f32 %v2799_v54, %v2754_v14  ;;  %v2840_v20 = vadd.f32 %v5489_v47, %v2832_v55  ;;  %v52_v14 = vadd.s32 8, %v5067_v9 }
 0xfa4   :  { %v2833_v21 = vmax.f32 %v2817_v7, %v2825_v16  ;;  %v2818_v11 = vadd.f32 %v3639_v56, %v2810_v18  ;;  %v2856_v23 = vsel %vm468_vm8, %v2840_v20, -inf  ;;  %v67_v16 = vand.u32 31, %v5067_v9 }
 0xfa5   :  { %2857 = vmax.xlane.f32.xlu0 %v2856_v23  ;;  %v2758_v10 = vpop.permute.xlu0 %2757  ;;  %v68_v18 = vand.u32 31, %v52_v14 }
 0xfa6   :  { %v2826_v58 = vmul.f32 0.2, %v2818_v11  ;;  %v2811_v27 = vadd.f32 %v2799_v54, %v2758_v10  ;;  %v2841_v15 = vadd.f32 %v5502_v19, %v2833_v21  ;;  %vm83_vm9 = vcmp.eq.s32.totalorder %v67_v16, %v5032_v51 }
 0xfa7   :  { %vm84_vm10 = vcmp.eq.s32.totalorder %v68_v18, %v5032_v51  ;;  %v54_v21 = vadd.s32 24, %v5067_v9  ;;  %v55_v10 = vadd.s32 32, %v5067_v9 }
 0xfa8   :  { %v2819_v8 = vadd.f32 %v3640_v26, %v2811_v27  ;;  %v2859_v17 = vsel %vm468_vm8, %v2841_v15, -inf  ;;  %v2834_v50 = vmax.f32 %v2818_v11, %v2826_v58  ;;  %vm4700_vm11 = vmpackc.low %vm84_vm10, %vm83_vm9  ;;  %v4882_v11 = vmov 0.25|0.25  }
 0xfa9   :  { %2860 = vmax.xlane.f32.xlu1 %v2859_v17  ;;  %v70_v26 = vand.u32 31, %v54_v21  ;;  %v56_v58 = vadd.s32 40, %v5067_v9  ;;  %v71_v27 = vand.u32 31, %v55_v10  ;;  %v58_v17 = vadd.s32 56, %v5067_v9 }
 0xfaa   :  { %v2827_v63 = vmul.f32 0.2, %v2819_v8  ;;  %v2842_v28 = vadd.f32 %v5489_v47, %v2834_v50 }
 0xfab   :  { %vm86_vm13 = vcmp.eq.s32.totalorder %v70_v26, %v5032_v51  ;;  %vm87_vm15 = vcmp.eq.s32.totalorder %v71_v27, %v5032_v51  ;;  %v4883_v27 = vmov 0.0|0.0  }
 0xfac   :  { %v2835_v30 = vmax.f32 %v2819_v8, %v2827_v63  ;;  %v2862_v32 = vsel %vm468_vm8, %v2842_v28, -inf  ;;  %v57_v8 = vadd.s32 48, %v5067_v9  ;;  %v74_v63 = vand.u32 31, %v58_v17 }
 0xfad   :  { %2863 = vmax.xlane.f32.xlu0 %v2862_v32 }
 0xfae   :  { %v2843_v33 = vadd.f32 %v5502_v19, %v2835_v30  ;;  %v73_v50 = vand.u32 31, %v57_v8  ;;  %vm90_vm3 = vcmp.eq.s32.totalorder %v74_v63, %v5032_v51  ;;  %v60_v30 = vadd.s32 72, %v5067_v9  ;;  %v3431_v63 = vld [vmem:[%s5819_s6] sm:$0xff] }
 0xfb0   :  { %v2865_v34 = vsel %vm468_vm8, %v2843_v33, -inf  ;;  %vm89_vm2 = vcmp.eq.s32.totalorder %v73_v50, %v5032_v51 }
 0xfb1   :  { %2866 = vmax.xlane.f32.xlu1 %v2865_v34  ;;  %vm4712_vm4 = vmpackc.low %vm90_vm3, %vm89_vm2  ;;  %v61_v34 = vadd.s32 80, %v5067_v9  ;;  %vm4884_vm2 = vmmov 0   ;;  %vm3436_vm3 = vcmask 261120  }
0x1022   :  { %v2846_v35 = vpop.xlane.xlu0 %2845 }
0x1023   :  { %v2868_v1 = vsub.f32 %v5683_v22, %v2846_v35  ;;  %v62_v35 = vadd.s32 88, %v5067_v9 }
0x1025   :  { %v2876_v36 = vmul.f32 1.442695, %v2868_v1  ;;  %v77_v1 = vand.u32 31, %v61_v34  ;;  %v3433_v34 = vld [vmem:[%s5819_s6 + $0x10] sm:$0xff] }
0x1026   :  { %v2849_v49 = vpop.xlane.xlu1 %2848 }
0x1027   :  { %4842 = vpow2.f32 %v2876_v36  ;;  %v2869_v4 = vsub.f32 %v2837_v42, %v2849_v49  ;;  %v78_v36 = vand.u32 31, %v62_v35  ;;  %vm93_vm9 = vcmp.eq.s32.totalorder %v77_v1, %v5032_v51  ;;  %v3434_v35 = vld [vmem:[%s5819_s6 + $0x18] sm:$0xff] }
0x1028   :  { %v63_v49 = vadd.s32 96, %v5067_v9  ;;  %v4739_v1 = vpack.c.bf16 %v3434_v35, %v3433_v34 }
0x1029   :  { %v2878_v25 = vmul.f32 1.442695, %v2869_v4  ;;  %vm94_vm10 = vcmp.eq.s32.totalorder %v78_v36, %v5032_v51  ;;  %v64_v4 = vadd.s32 104, %v5067_v9 }
0x102a   :  { %v2852_v38 = vpop.xlane.xlu0 %2851 }
0x102b   :  { %4844 = vpow2.f32 %v2878_v25  ;;  %v2870_v47 = vsub.f32 %v2838_v60, %v2852_v38  ;;  %v79_v25 = vand.u32 31, %v63_v49  ;;  %v80_v38 = vand.u32 31, %v64_v4  ;;  %v3435_v4 = vld [vmem:[%s5821_s7] sm:$0x3] }
0x102d   :  { %v2880_v37 = vmul.f32 1.442695, %v2870_v47  ;;  %v65_v47 = vadd.s32 112, %v5067_v9 }
0x102e   :  { %v2855_v40 = vpop.xlane.xlu0 %2854 }
0x102f   :  { %4846 = vpow2.f32 %v2880_v37  ;;  %v2871_v5 = vsub.f32 %v2839_v3, %v2855_v40  ;;  %v66_v37 = vadd.s32 120, %v5067_v9  ;;  %v81_v40 = vand.u32 31, %v65_v47 }
0x1031   :  { %v4843_v41 = vpop.eup %4842  ;;  %v2882_v19 = vmul.f32 1.442695, %v2871_v5  ;;  %v82_v5 = vand.u32 31, %v66_v37 }
0x1032   :  { %4303 = vmatprep.mubr.msk.f32.mxu0 %vm468_vm8, %v4843_v41  ;;  %v2858_v44 = vpop.xlane.xlu0 %2857  ;;  %v2892_v45 = vsel %vm468_vm8, %v4843_v41, 0.0 }
0x1033   :  { %4848 = vpow2.f32 %v2882_v19  ;;  %v2872_v22 = vsub.f32 %v2840_v20, %v2858_v44  ;;  %2893 = vadd.xlane.f32.xlu0 %v2892_v45  ;;  %v53_v20 = vadd.s32 16, %v5067_v9 }
0x1035   :  { %v4845_v43 = vpop.eup %4844  ;;  %v2884_v42 = vmul.f32 1.442695, %v2872_v22  ;;  %v69_v23 = vand.u32 31, %v53_v20 }
0x1036   :  { %v2861_v6 = vpop.xlane.xlu1 %2860  ;;  %4304 = vmatmul.mubr.msk.f32.vlgmr.msra.gmra.mrb[16].mxu0 %vm468_vm8, %v4845_v43  ;;  %v2895_v29 = vsel %vm468_vm8, %v4845_v43, 0.0 }
0x1037   :  { %4850 = vpow2.f32 %v2884_v42  ;;  %v2873_v46 = vsub.f32 %v2841_v15, %v2861_v6  ;;  %4695 = vmatpush3.bf16.msra.mxu0 %v5658_v12  ;;  %2896 = vadd.xlane.f32.xlu0 %v2895_v29  ;;  %vm85_vm12 = vcmp.eq.s32.totalorder %v69_v23, %v5032_v51  ;;  %v72_v15 = vand.u32 31, %v56_v58  ;;  %v3682_v23 = vld [vmem:[%s5818_s4 + $0x3] ss:$0 sm:$0xff] }
0x1038   :  { %4701 = vmatprep.subr.msk.bf16.mxu0 %vm4700_vm11, %v4882_v11  ;;  %vm4704_vm14 = vmpackc.low %vm86_vm13, %vm85_vm12  ;;  %vm95_vm12 = vcmp.eq.s32.totalorder %v79_v25, %v5032_v51  ;;  %vm96_vm13 = vcmp.eq.s32.totalorder %v80_v38, %v5032_v51 }
0x1039   :  { %v4847_v48 = vpop.eup %4846  ;;  %v2886_v57 = vmul.f32 1.442695, %v2873_v46  ;;  %vm88_vm0 = vcmp.eq.s32.totalorder %v72_v15, %v5032_v51 }
0x103a   :  { %4310 = vmatprep.mubr.msk.f32.mxu1 %vm468_vm8, %v4847_v48  ;;  %v2864_v60 = vpop.xlane.xlu0 %2863  ;;  %v2898_v59 = vsel %vm468_vm8, %v4847_v48, 0.0  ;;  %vm4708_vm1 = vmpackc.low %vm88_vm0, %vm87_vm15  ;;  %vm97_vm15 = vcmp.eq.s32.totalorder %v81_v40, %v5032_v51  ;;  %vm98_vm0 = vcmp.eq.s32.totalorder %v82_v5, %v5032_v51 }
0x103b   :  { %4852 = vpow2.f32 %v2886_v57  ;;  %v2874_v61 = vsub.f32 %v2842_v28, %v2864_v60  ;;  %2899 = vadd.xlane.f32.xlu1 %v2898_v59  ;;  %v59_v28 = vadd.s32 64, %v5067_v9 }
0x103d   :  { %v4849_v24 = vpop.eup %4848  ;;  %v2888_v31 = vmul.f32 1.442695, %v2874_v61  ;;  %v75_v32 = vand.u32 31, %v59_v28  ;;  %v3432_v28 = vld [vmem:[%s5819_s6 + $0x8] sm:$0xff] }
0x103e   :  { %v2867_v62 = vpop.xlane.xlu1 %2866  ;;  %4311 = vmatmul.mubr.msk.f32.vlgmr.msra.gmra.mrb[24].mxu1 %vm468_vm8, %v4849_v24  ;;  %v2901_v39 = vsel %vm468_vm8, %v4849_v24, 0.0 }
0x103f   :  { %4854 = vpow2.f32 %v2888_v31  ;;  %v2875_v12 = vsub.f32 %v2843_v33, %v2867_v62  ;;  %4699 = vmatpush3.bf16.msra.mxu1 %v5660_v13  ;;  %2902 = vadd.xlane.f32.xlu1 %v2901_v39  ;;  %v76_v33 = vand.u32 31, %v60_v30  ;;  %vm91_vm5 = vcmp.eq.s32.totalorder %v75_v32, %v5032_v51  ;;  %v3357_v32 = vld [vmem:[%s5820_s5] sm:$0x3] }
0x1040   :  { %4732 = vmatprep.subr.bf16.mxu1 %v4883_v27 }
0x1041   :  { %v4851_v0 = vpop.eup %4850  ;;  %v2890_v2 = vmul.f32 1.442695, %v2875_v12  ;;  %vm92_vm6 = vcmp.eq.s32.totalorder %v76_v33, %v5032_v51  ;;  %v4736_v33 = vpack.c.bf16 %v3432_v28, %v3431_v63 }
0x1042   :  { %4317 = vmatprep.mubr.msk.f32.mxu0 %vm468_vm8, %v4851_v0  ;;  %v2904_v3 = vsel %vm468_vm8, %v4851_v0, 0.0  ;;  %vm4716_vm7 = vmpackc.low %vm92_vm6, %vm91_vm5 }
0x1043   :  { %4856 = vpow2.f32 %v2890_v2  ;;  %2905 = vadd.xlane.f32.xlu0 %v2904_v3 }
0x1045   :  { %v4853_v7 = vpop.eup %4852 }
0x1046   :  { %4318 = vmatmul.mubr.msk.f32.vlgmr.msra.gmra.mrb[18].mxu0 %vm468_vm8, %v4853_v7  ;;  %v2907_v53 = vsel %vm468_vm8, %v4853_v7, 0.0 }
0x1047   :  { %2908 = vadd.xlane.f32.xlu1 %v2907_v53  ;;  %4703 = vmatpush3.bf16.msk.msra.mxu0 %vm4700_vm11, %v4882_v11  ;;  %vm4720_vm11 = vmpackc.low %vm94_vm10, %vm93_vm9 }
0x1048   :  { %4705 = vmatprep.subr.msk.bf16.mxu0 %vm4704_vm14, %v4882_v11 }
0x1049   :  { %v4855_v54 = vpop.eup %4854 }
0x104a   :  { %4324 = vmatprep.mubr.msk.f32.mxu1 %vm468_vm8, %v4855_v54  ;;  %v2910_v13 = vsel %vm468_vm8, %v4855_v54, 0.0 }
0x104b   :  { %2911 = vadd.xlane.f32.xlu0 %v2910_v13  ;;  %4707 = vmatpush3.bf16.msk.msra.mxu0 %vm4704_vm14, %v4882_v11  ;;  %vm4724_vm14 = vmpackc.low %vm96_vm13, %vm95_vm12 }
0x104c   :  { %4709 = vmatprep.subr.msk.bf16.mxu0 %vm4708_vm1, %v4882_v11 }
0x104d   :  { %v4857_v55 = vpop.eup %4856 }
0x104e   :  { %4325 = vmatmul.mubr.msk.f32.vlgmr.msra.gmra.mrb[26].mxu1 %vm468_vm8, %v4857_v55  ;;  %v2913_v56 = vsel %vm468_vm8, %v4857_v55, 0.0 }
0x104f   :  { %2914 = vadd.xlane.f32.xlu1 %v2913_v56  ;;  %4711 = vmatpush3.bf16.msk.msra.mxu0 %vm4708_vm1, %v4882_v11  ;;  %vm4728_vm1 = vmpackc.low %vm98_vm0, %vm97_vm15 }
0x1050   :  { %4713 = vmatprep.subr.msk.bf16.mxu0 %vm4712_vm4, %v4882_v11  ;;  %4366 = vmatprep.mubr.msk.f32.mxu1 %vm4884_vm2, %v4880_v52 }
0x1053   :  { %4715 = vmatpush3.bf16.msk.msra.mxu0 %vm4712_vm4, %v4882_v11 }
0x1054   :  { %4717 = vmatprep.subr.msk.bf16.mxu0 %vm4716_vm7, %v4882_v11 }
0x1057   :  { %4719 = vmatpush3.bf16.msk.msra.mxu0 %vm4716_vm7, %v4882_v11 }
0x1058   :  { %4721 = vmatprep.subr.msk.bf16.mxu0 %vm4720_vm11, %v4882_v11 }
0x105b   :  { %4723 = vmatpush3.bf16.msk.msra.mxu0 %vm4720_vm11, %v4882_v11 }
0x105c   :  { %4725 = vmatprep.subr.msk.bf16.mxu0 %vm4724_vm14, %v4882_v11 }
0x105f   :  { %4727 = vmatpush3.bf16.msk.msra.mxu0 %vm4724_vm14, %v4882_v11 }
0x1060   :  { %4729 = vmatprep.subr.msk.bf16.mxu0 %vm4728_vm1, %v4882_v11 }
0x1063   :  { %4731 = vmatpush3.bf16.msk.msra.mxu0 %vm4728_vm1, %v4882_v11 }
0x10c0   :  { %v2894_v41 = vpop.xlane.xlu0 %2893 }
0x10c1   :  { %4858 = vrcp.f32 %v2894_v41 }
0x10c4   :  { %v2897_v44 = vpop.xlane.xlu0 %2896 }
0x10c5   :  { %4860 = vrcp.f32 %v2897_v44 }
0x10c8   :  { %v2900_v19 = vpop.xlane.xlu1 %2899 }
0x10cb   :  { %v4859_v6 = vpop.eup %4858 }
0x10cc   :  { %v2903_v9 = vpop.xlane.xlu1 %2902 }
0x10cd   :  { %4862 = vrcp.f32 %v2903_v9 }
0x10ce   :  { %4864 = vrcp.f32 %v2900_v19 }
0x10cf   :  { %v4861_v51 = vpop.eup %4860 }
0x10d0   :  { %v2906_v42 = vpop.xlane.xlu0 %2905 }
0x10d4   :  { %v2909_v43 = vpop.xlane.xlu1 %2908 }
0x10d5   :  { %4866 = vrcp.f32 %v2909_v43 }
0x10d6   :  { %4868 = vrcp.f32 %v2906_v42 }
0x10d7   :  { %v4863_v29 = vpop.eup %4862 }
0x10d8   :  { %v4865_v48 = vpop.eup %4864  ;;  %v2912_v39 = vpop.xlane.xlu0 %2911 }
0x10dc   :  { %v2915_v31 = vpop.xlane.xlu1 %2914 }
0x10dd   :  { %4870 = vrcp.f32 %v2915_v31 }
0x10de   :  { %4872 = vrcp.f32 %v2912_v39 }
0x10df   :  { %v4867_v0 = vpop.eup %4866 }
0x10e0   :  { %v4869_v3 = vpop.eup %4868 }
0x10e7   :  { %v4871_v56 = vpop.eup %4870 }
0x10e8   :  { %v4873_v16 = vpop.eup %4872 }
0x1109   :  { %v4305_v45 = vpop.f32.mrb[16].mxu0 }
0x110a   :  { %v3004_v22 = vpop.f32.mrb[17].mxu0  ;;  %v3257_v57 = vmul.f32 %v4861_v51, %v4305_v45 }
0x110b   :  { %v3256_v61 = vmul.f32 %v4859_v6, %v3004_v22 }
0x1111   :  { %v4312_v46 = vpop.f32.mrb[24].mxu1 }
0x1112   :  { %v3259_v60 = vmul.f32 %v4863_v29, %v4312_v46  ;;  %v3085_v59 = vpop.f32.mrb[25].mxu1 }
0x1113   :  { %v3258_v24 = vmul.f32 %v4865_v48, %v3085_v59 }
0x1114   :  { %v3267_v62 = vadd.f32 %v3259_v60, %v3257_v57 }
0x1115   :  { %v3264_v12 = vadd.f32 %v3258_v24, %v3256_v61 }
0x1119   :  { %v4319_v2 = vpop.f32.mrb[18].mxu0 }
0x111a   :  { %v3261_v7 = vmul.f32 %v4867_v0, %v4319_v2  ;;  %v3166_v53 = vpop.f32.mrb[19].mxu0 }
0x111b   :  { %v3260_v54 = vmul.f32 %v4869_v3, %v3166_v53 }
0x111c   :  { %v3268_v13 = vadd.f32 %v3267_v62, %v3261_v7 }
0x111d   :  { %v3265_v55 = vadd.f32 %v3264_v12, %v3260_v54 }
0x1121   :  { %v4326_v14 = vpop.f32.mrb[26].mxu1 }
0x1122   :  { %v3263_v18 = vmul.f32 %v4871_v56, %v4326_v14  ;;  %v3247_v20 = vpop.f32.mrb[27].mxu1 }
0x1123   :  { %v3262_v21 = vmul.f32 %v4873_v16, %v3247_v20 }
0x1124   :  { %v3269_v11 = vadd.f32 %v3268_v13, %v3263_v18 }
0x1125   :  { %v3266_v26 = vadd.f32 %v3265_v55, %v3262_v21 }
0x1126   :  { %v3279_v58 = vadd.f32 %v3682_v23, %v3269_v11 }
0x1127   :  { %v3278_v10 = vadd.f32 %v3682_v23, %v3266_v26 }
0x1129   :  { %4359 = vmatprep.mubr.f32.mxu0 %v3278_v10 }
0x112a   :  { %4360 = vmatmul.mubr.f32.vlgmr.msra.gmra.mrb[20].mxu0 %v3279_v58 }
0x11fd   :  { %v4361_v15 = vpop.f32.mrb[20].mxu0 }
0x11fe   :  { %v3356_v8 = vmax.f32 %v4361_v15, 0.0  ;;  %v3346_v17 = vpop.f32.mrb[21].mxu0 }
0x11ff   :  { %v3355_v50 = vmax.f32 %v3346_v17, 0.0 }
0x1201   :  { %v4733_v30 = vpack.c.bf16 %v3356_v8, %v3355_v50 }
0x1203   :  { %4734 = vmatpush3.bf16.msra.mxu1 %v4733_v30 }
0x1204   :  { %4735 = vmatprep.subr.bf16.mxu1 %v4883_v27 }
0x1206   :  { %4367 = vmatmul.mubr.msk.f32.vlgmr.msra.gmra.mrb[28].mxu1 %vm468_vm8, %v3357_v32  ;;  %vm3516_vm8 = vcmask 1024  }
0x1207   :  { %4737 = vmatpush3.bf16.msra.mxu1 %v4736_v33  ;;  %4377 = vmatprep.mubr.msk.f32.mxu1 %vm4884_vm2, %v4880_v52 }
0x1208   :  { %4738 = vmatprep.subr.bf16.mxu1 %v4883_v27 }
0x120b   :  { %4740 = vmatpush3.bf16.msra.mxu1 %v4739_v1 }
0x12d9   :  { %v3427_v36 = vpop.f32.mrb[28].mxu1 }
0x12da   :  { %v4368_v49 = vpop.f32.mrb[29].mxu1  ;;  %4378 = vmatmul.mubr.msk.f32.vlgmr.msra.gmra.mrb[30].mxu1 %vm3436_vm3, %v3427_v36 }
0x13ad   :  { %v3506_v25 = vpop.f32.mrb[30].mxu1 }
0x13ae   :  { %v3507_v38 = vadd.f32 %v3506_v25, %v3435_v4  ;;  %v4379_v47 = vpop.f32.mrb[31].mxu1 }
0x13b0   :  { %v3510_v37 = vsub.f32 0.0, %v3507_v38 }
0x13b2   :  { %v3511_v40 = vmul.f32 1.442695, %v3510_v37 }
0x13b4   :  { %4874 = vpow2.f32 %v3511_v40 }
0x13be   :  { %v4875_v5 = vpop.eup %4874 }
0x13bf   :  { %v3513_v41 = vadd.f32 1.0, %v4875_v5 }
0x13c1   :  { %4876 = vrcp.f32 %v3513_v41 }
0x13cb   :  { %v4877_v52 = vpop.eup %4876 }
0x13cc   :  { %3517 = vst.msk [vmem:[%s5822_s8] sm:$0x3] %vm3516_vm8, %v4877_v52 }

</bundles_post_ra>
